<compile_context>
chip_gen: v6e
topology: v6e:2x2x1
jax: 0.10.0
libtpu: 0.0.40
codegen_flags: <defaults>
</compile_context>

<pallas_src>
import functools

import jax
import jax.numpy as jnp
from jax import lax
from jax.experimental import pallas as pl
from jax.experimental.pallas import tpu as pltpu

BN_EPS = 1e-5  # torch.nn.BatchNorm1d default


def _round_up(x, m):
    return -(-x // m) * m


# ---------------------------------------------------------------------------
# Kernel: global-average-pool (channel-chunked, accumulated into f32 scratch via pooled @ w1)
# + bias/ReLU + two small matmuls in the last-chunk epilogue.
# ---------------------------------------------------------------------------
def _head_kernel(inv_hw,
                 feats_ref,          # (TB, HW, CC) bf16 — channel-minor (lane-dense) chunk
                 w1_ref, b1_ref,     # (CC, H1) bf16, (1, H1) f32   (BN1 folded)
                 w2_ref, b2_ref,     # (H1, H2) bf16, (1, H2) f32   (BN2 folded)
                 w3_ref, b3_ref,     # (H2, NCP) bf16, (1, NCP) f32 (classes zero-padded)
                 out_ref,            # (TB, NCP) f32
                 acc_ref):           # (TB, H1)  f32 scratch accumulator
    c = pl.program_id(1)

    @pl.when(c == 0)
    def _():
        acc_ref[...] = jnp.zeros_like(acc_ref)

    # adaptive_avg_pool2d(., 1) + flatten on this channel chunk: sum over the spatial (sublane)
    # axis with f32 accumulation, scale to a mean, then feed the MXU in bf16.
    pooled = jnp.sum(feats_ref[...], axis=1, dtype=jnp.float32) * inv_hw     # (TB, CC) f32
    acc_ref[...] += jnp.dot(pooled.astype(jnp.bfloat16), w1_ref[...],
                            preferred_element_type=jnp.float32)              # (TB, H1)

    # Epilogue once all channel chunks have been accumulated. Dropout is identity in eval mode;
    # eval-mode BatchNorm1d is folded into the weights/biases.
    @pl.when(c == pl.num_programs(1) - 1)
    def _():
        h1 = jnp.maximum(acc_ref[...] + b1_ref[...], 0.0).astype(jnp.bfloat16)      # (TB, H1)
        h2 = jnp.dot(h1, w2_ref[...], preferred_element_type=jnp.float32) + b2_ref[...]
        h2 = jnp.maximum(h2, 0.0).astype(jnp.bfloat16)                               # (TB, H2)
        out = jnp.dot(h2, w3_ref[...], preferred_element_type=jnp.float32) + b3_ref[...]
        out_ref[...] = out.astype(out_ref.dtype)                                     # (TB, NCP)


# ---------------------------------------------------------------------------
# Parameter folding: eval-mode BN into the Linear weights/biases, lane-aligned class padding.
# ---------------------------------------------------------------------------
def fold_head_params(raw_params, num_classes):
    (w1, b1, g1, beta1, mu1, var1,
     w2, b2, g2, beta2, mu2, var2,
     w3, b3) = raw_params

    s1 = g1 * lax.rsqrt(var1 + BN_EPS)                    # (1, H1)
    w1f = w1 * s1
    b1f = (b1 - mu1) * s1 + beta1

    s2 = g2 * lax.rsqrt(var2 + BN_EPS)                    # (1, H2)
    w2f = w2 * s2
    b2f = (b2 - mu2) * s2 + beta2

    nc_pad = _round_up(num_classes, 128)
    w3p = jnp.pad(w3, ((0, 0), (0, nc_pad - num_classes)))
    b3p = jnp.pad(b3, ((0, 0), (0, nc_pad - num_classes)))

    return (w1f.astype(jnp.bfloat16), b1f.astype(jnp.float32),
            w2f.astype(jnp.bfloat16), b2f.astype(jnp.float32),
            w3p.astype(jnp.bfloat16), b3p.astype(jnp.float32))


# ---------------------------------------------------------------------------
# Tiling / VMEM heuristics
# ---------------------------------------------------------------------------
def _vmem_capacity_bytes():
    """Per-TensorCore VMEM capacity; conservative 64 MiB (v7x) fallback."""
    try:
        info = pltpu.get_tpu_info()
        cap = getattr(info, "vmem_capacity_bytes", None)
        if cap:
            return int(cap)
    except Exception:
        pass
    return 64 << 20


def _padded_tile_bytes(shape, dtype):
    """VMEM footprint of one buffer: minor dim padded to 128 lanes, second-minor to the native
    sublane tiling (8 for 32-bit, 16 for bf16)."""
    itemsize = jnp.dtype(dtype).itemsize
    sublane = {4: 8, 2: 16, 1: 32}.get(itemsize, 8)
    dims = list(shape)
    dims[-1] = _round_up(dims[-1], 128)
    if len(dims) >= 2:
        dims[-2] = _round_up(dims[-2], sublane)
    n = 1
    for d in dims:
        n *= int(d)
    return n * itemsize


def _working_set_bytes(tb, hw, cc, h1, h2, ncp):
    bf, f32 = jnp.bfloat16, jnp.float32
    per_buf = (_padded_tile_bytes((tb, hw, cc), bf) +     # feature chunk
               _padded_tile_bytes((cc, h1), bf) +         # w1 chunk
               _padded_tile_bytes((1, h1), f32) +
               _padded_tile_bytes((h1, h2), bf) +
               _padded_tile_bytes((1, h2), f32) +
               _padded_tile_bytes((h2, ncp), bf) +
               _padded_tile_bytes((1, ncp), f32) +
               _padded_tile_bytes((tb, ncp), f32))        # output tile
    # Pallas double-buffers every operand (grid-invariant weight blocks are not re-DMA'd but still
    # get two buffers); the accumulator scratch is a single buffer.
    return 2 * per_buf + _padded_tile_bytes((tb, h1), f32)


def _pick_c_chunk(C, requested):
    if requested is not None:
        assert C % requested == 0, "block_c must divide the channel count"
        assert requested % 128 == 0 or requested == C, "block_c must be a multiple of 128"
        return requested
    if C % 128 != 0:
        return C                      # cannot lane-chunk cleanly; take the whole channel dim
    best = C
    for cand in range(512, 127, -128):  # largest multiple-of-128 divisor <= 512 with >= 2 chunks
        if C % cand == 0 and cand < C:
            best = cand
            break
    return best


def _pick_batch_tile(B, tb_cap, requested):
    if requested is not None:
        tb = max(1, min(requested, B))
        assert tb == B or tb % 8 == 0, "batch tile must be a multiple of 8 when < batch"
        return tb
    if B <= 8 or B % 8 != 0:
        # TODO(synk): ragged batches fall back to a single full tile (or a padded tail if huge);
        # prefer batch sizes with a multiple-of-8 divisor.
        return B if B <= tb_cap else tb_cap
    # B is a multiple of 8: largest multiple-of-8 divisor of B that fits the VMEM-driven cap and
    # leaves >= 2 grid steps on the parallel batch axis (so v7x's two TensorCores both get work).
    limit = min(tb_cap, max(8, _round_up(-(-B // 2), 8)))
    tb = 8
    for cand in range(8, limit + 1, 8):
        if B % cand == 0:
            tb = cand
    return tb


# ---------------------------------------------------------------------------
# Wrapper
# ---------------------------------------------------------------------------
def efficientnet_head_forward(features_nchw, folded_params, num_classes, *,
                              block_b=None, block_c=None):
    """features_nchw: (B, C, H, W) backbone feature map (PyTorch layout)."""
    B, C, H, W = features_nchw.shape
    HW = H * W

    # Lane-dense layout: channel-minor (B, HW, C) so the 128-lane axis is fully dense. This is
    # layout plumbing (a TPU backbone would emit NHWC directly); under jit the transpose and the
    # f32->bf16 cast fuse with the producer of the feature map.
    feats = jnp.transpose(features_nchw.reshape(B, C, HW), (0, 2, 1)).astype(jnp.bfloat16)

    w1f, b1f, w2f, b2f, w3p, b3p = folded_params
    H1, H2, NCP = w1f.shape[1], w2f.shape[1], w3p.shape[1]
    assert w1f.shape[0] == C

    CC = _pick_c_chunk(C, block_c)
    cap = _vmem_capacity_bytes()
    budget = (cap * 3) // 4                       # leave headroom for Mosaic internal scratch
    tb_cap = 128 if cap >= (128 << 20) else 64    # v5e/v6e can afford bigger tiles than v7x
    TB = _pick_batch_tile(B, tb_cap, block_b)

    headroom = 2 << 20
    needed = _working_set_bytes(TB, HW, CC, H1, H2, NCP)
    while needed + headroom > budget and TB > 8:  # shrink the tile; never clamp the limit below it
        TB = max(8, _round_up(TB // 2, 8))
        needed = _working_set_bytes(TB, HW, CC, H1, H2, NCP)
    vmem_limit = int(max(needed + headroom, 32 << 20))

    Bp = _round_up(B, TB)
    if Bp != B:
        feats = jnp.pad(feats, ((0, Bp - B), (0, 0), (0, 0)))

    grid = (Bp // TB, C // CC)

    weight_bytes = sum(int(p.size) * p.dtype.itemsize for p in folded_params)
    flops = 2 * Bp * (C * H1 + H1 * H2 + H2 * NCP) + Bp * HW * C
    bytes_accessed = int(feats.size) * feats.dtype.itemsize + weight_bytes + Bp * NCP * 4

    out_padded = pl.pallas_call(
        functools.partial(_head_kernel, 1.0 / float(HW)),
        out_shape=jax.ShapeDtypeStruct((Bp, NCP), jnp.float32),
        grid_spec=pltpu.PrefetchScalarGridSpec(
            num_scalar_prefetch=0,
            grid=grid,
            in_specs=[
                pl.BlockSpec((TB, HW, CC), lambda i, c: (i, 0, c)),   # batch x channel-chunk tiles
                pl.BlockSpec((CC, H1), lambda i, c: (c, 0)),          # matching w1 chunk
                pl.BlockSpec((1, H1), lambda i, c: (0, 0)),           # grid-invariant blocks below
                pl.BlockSpec((H1, H2), lambda i, c: (0, 0)),
                pl.BlockSpec((1, H2), lambda i, c: (0, 0)),
                pl.BlockSpec((H2, NCP), lambda i, c: (0, 0)),
                pl.BlockSpec((1, NCP), lambda i, c: (0, 0)),
            ],
            out_specs=pl.BlockSpec((TB, NCP), lambda i, c: (i, 0)),
            scratch_shapes=[pltpu.VMEM((TB, H1), jnp.float32)],
        ),
        compiler_params=pltpu.CompilerParams(
            dimension_semantics=("parallel", "arbitrary"),
            vmem_limit_bytes=vmem_limit,
        ),
        cost_estimate=pl.CostEstimate(
            flops=flops, transcendentals=0, bytes_accessed=bytes_accessed),
    )(feats, w1f, b1f, w2f, b2f, w3p, b3p)

    return out_padded[:B, :num_classes]


# ---------------------------------------------------------------------------
# Deterministic synthetic parameters (PyTorch-style init), weights stored as (in, out).
# ---------------------------------------------------------------------------
def init_params(key, in_features, hidden1, hidden2, num_classes):
    k_lin1, k_lin2, k_lin3, k_bn1, k_bn2 = jax.random.split(key, 5)

    def linear(k, fan_in, fan_out):
        kw, kb = jax.random.split(k)
        bound = 1.0 / jnp.sqrt(jnp.float32(fan_in))
        w = jax.random.uniform(kw, (fan_in, fan_out), jnp.float32, -bound, bound)
        b = jax.random.uniform(kb, (1, fan_out), jnp.float32, -bound, bound)
        return w, b

    def batchnorm(k, n):
        k1, k2, k3, k4 = jax.random.split(k, 4)
        gamma = 1.0 + 0.1 * jax.random.normal(k1, (1, n), jnp.float32)
        beta = 0.1 * jax.random.normal(k2, (1, n), jnp.float32)
        mu = 0.1 * jax.random.normal(k3, (1, n), jnp.float32)
        var = 0.5 + jax.random.uniform(k4, (1, n), jnp.float32, 0.0, 1.0)
        return gamma, beta, mu, var

    w1, b1 = linear(k_lin1, in_features, hidden1)
    g1, beta1, mu1, var1 = batchnorm(k_bn1, hidden1)
    w2, b2 = linear(k_lin2, hidden1, hidden2)
    g2, beta2, mu2, var2 = batchnorm(k_bn2, hidden2)
    w3, b3 = linear(k_lin3, hidden2, num_classes)

    return (w1, b1, g1, beta1, mu1, var1,
            w2, b2, g2, beta2, mu2, var2,
            w3, b3)


def reference_forward(features_nchw, raw_params, num_classes):
    """Plain-JAX f32 reference implementing the exact eval-mode module math (unfolded BN)."""
    (w1, b1, g1, beta1, mu1, var1,
     w2, b2, g2, beta2, mu2, var2,
     w3, b3) = raw_params
    pooled = jnp.mean(features_nchw, axis=(2, 3))                                   # (B, C)
    h1 = pooled @ w1 + b1
    h1 = jnp.maximum((h1 - mu1) / jnp.sqrt(var1 + BN_EPS) * g1 + beta1, 0.0)
    h2 = h1 @ w2 + b2
    h2 = jnp.maximum((h2 - mu2) / jnp.sqrt(var2 + BN_EPS) * g2 + beta2, 0.0)
    return h2 @ w3 + b3


if __name__ == "__main__":
    # Small shapes consistent with the module: batch=16, backbone feature channels=256
    # (stand-in for EfficientNet-B2's 1408 = 11x128), spatial 8x8, head hidden 512 -> 256,
    # 14 classes. Auto-tiling gives TB=8 (2 parallel batch tiles) and CC=128 (2 channel chunks),
    # exercising both grid axes and the scratch accumulator.
    B, C, H, W = 16, 256, 8, 8
    HIDDEN1, HIDDEN2 = 512, 256
    NUM_CLASSES = 14

    root = jax.random.PRNGKey(0)
    k_feat, k_params = jax.random.split(root)

    features_nchw = jax.random.normal(k_feat, (B, C, H, W), jnp.float32)
    raw_params = init_params(k_params, C, HIDDEN1, HIDDEN2, NUM_CLASSES)
    folded_params = fold_head_params(raw_params, NUM_CLASSES)

    out = efficientnet_head_forward(features_nchw, folded_params, NUM_CLASSES)
    out = jax.block_until_ready(out)

    ref = reference_forward(features_nchw, raw_params, NUM_CLASSES)
    assert out.shape == (B, NUM_CLASSES), out.shape
    max_diff = float(jnp.max(jnp.abs(out - ref)))
    assert jnp.allclose(out, ref, rtol=5e-2, atol=5e-2), f"max abs diff = {max_diff}"

    print("KERNEL_OK")
</pallas_src>

<mosaic_0001>
module attributes {stable_mosaic.version = 11 : i64} {
  func.func @_head_kernel(%arg0: i32, %arg1: i32, %arg2: memref<8x64x128xbf16, #tpu.memory_space<vmem>>, %arg3: memref<128x512xbf16, #tpu.memory_space<vmem>>, %arg4: memref<1x512xf32, #tpu.memory_space<vmem>>, %arg5: memref<512x256xbf16, #tpu.memory_space<vmem>>, %arg6: memref<1x256xf32, #tpu.memory_space<vmem>>, %arg7: memref<256x128xbf16, #tpu.memory_space<vmem>>, %arg8: memref<1x128xf32, #tpu.memory_space<vmem>>, %arg9: memref<8x128xf32, #tpu.memory_space<vmem>>, %arg10: memref<8x512xf32, #tpu.memory_space<vmem>>) attributes {dimension_semantics = [#tpu.dimension_semantics<parallel>, #tpu.dimension_semantics<arbitrary>], iteration_bounds = array<i64: 2, 2>, scalar_prefetch = 0 : i64, scratch_operands = 1 : i64, tpu.core_type = #tpu.core_type<tc>, window_params = [{transform_indices = @transform_0, window_bounds = array<i64: 8, 64, 128>}, {transform_indices = @transform_1, window_bounds = array<i64: 128, 512>}, {pipeline_mode = #tpu.pipeline_mode<synchronous>, transform_indices = @transform_2, window_bounds = array<i64: 1, 512>}, {pipeline_mode = #tpu.pipeline_mode<synchronous>, transform_indices = @transform_3, window_bounds = array<i64: 512, 256>}, {pipeline_mode = #tpu.pipeline_mode<synchronous>, transform_indices = @transform_4, window_bounds = array<i64: 1, 256>}, {pipeline_mode = #tpu.pipeline_mode<synchronous>, transform_indices = @transform_5, window_bounds = array<i64: 256, 128>}, {pipeline_mode = #tpu.pipeline_mode<synchronous>, transform_indices = @transform_6, window_bounds = array<i64: 1, 128>}, {transform_indices = @transform_7, window_bounds = array<i64: 8, 128>}]} {
    %c0_i32 = arith.constant 0 : i32
    %0 = arith.cmpi eq, %arg1, %c0_i32 : i32
    %1 = arith.extui %0 : i1 to i32
    %c0_i32_0 = arith.constant 0 : i32
    %2 = arith.cmpi ne, %1, %c0_i32_0 : i32
    scf.if %2 {
      %cst_12 = arith.constant 0.000000e+00 : f32
      %17 = vector.broadcast %cst_12 : f32 to vector<8x512xf32>
      %c0_13 = arith.constant 0 : index
      %c0_14 = arith.constant 0 : index
      %18 = vector.load %arg10[%c0_13, %c0_14] : memref<8x512xf32, #tpu.memory_space<vmem>>, vector<8x512xf32>
      tpu.vector_store %arg10[%c0_13, %c0_14], %17 {strides = array<i32>} : memref<8x512xf32, #tpu.memory_space<vmem>>, vector<8x512xf32>,
    } else {
    }
    %c0 = arith.constant 0 : index
    %c0_1 = arith.constant 0 : index
    %c0_2 = arith.constant 0 : index
    %3 = vector.load %arg2[%c0, %c0_1, %c0_2] : memref<8x64x128xbf16, #tpu.memory_space<vmem>>, vector<8x64x128xbf16>
    %4 = arith.extf %3 : vector<8x64x128xbf16> to vector<8x64x128xf32>
    %cst = arith.constant dense<0.000000e+00> : vector<8x128xf32>
    %5 = vector.multi_reduction <add>, %4, %cst [1] : vector<8x64x128xf32> to vector<8x128xf32>
    %cst_3 = arith.constant 1.562500e-02 : f32
    %6 = vector.broadcast %cst_3 : f32 to vector<8x128xf32>
    %7 = arith.mulf %5, %6 : vector<8x128xf32>
    %c0_4 = arith.constant 0 : index
    %c0_5 = arith.constant 0 : index
    %8 = vector.load %arg10[%c0_4, %c0_5] : memref<8x512xf32, #tpu.memory_space<vmem>>, vector<8x512xf32>
    %9 = arith.truncf %7 : vector<8x128xf32> to vector<8x128xbf16>
    %c0_6 = arith.constant 0 : index
    %c0_7 = arith.constant 0 : index
    %10 = vector.load %arg3[%c0_6, %c0_7] : memref<128x512xbf16, #tpu.memory_space<vmem>>, vector<128x512xbf16>
    %cst_8 = arith.constant dense<0.000000e+00> : vector<8x512xf32>
    %11 = tpu.matmul %9, %10, %cst_8 {dimension_numbers = #tpu.dot_dimension_numbers<[1], [0], [0], [1], [0, 0, 1, 1], [], []>} : vector<8x128xbf16>, vector<128x512xbf16>, vector<8x512xf32> -> vector<8x512xf32>
    %12 = arith.addf %8, %11 : vector<8x512xf32>
    %c0_9 = arith.constant 0 : index
    %c0_10 = arith.constant 0 : index
    %13 = vector.load %arg10[%c0_9, %c0_10] : memref<8x512xf32, #tpu.memory_space<vmem>>, vector<8x512xf32>
    tpu.vector_store %arg10[%c0_9, %c0_10], %12 {strides = array<i32>} : memref<8x512xf32, #tpu.memory_space<vmem>>, vector<8x512xf32>,
    %c1_i32 = arith.constant 1 : i32
    %14 = arith.cmpi eq, %arg1, %c1_i32 : i32
    %15 = arith.extui %14 : i1 to i32
    %c0_i32_11 = arith.constant 0 : i32
    %16 = arith.cmpi ne, %15, %c0_i32_11 : i32
    scf.if %16 {
      %c0_12 = arith.constant 0 : index
      %c0_13 = arith.constant 0 : index
      %17 = vector.load %arg10[%c0_12, %c0_13] : memref<8x512xf32, #tpu.memory_space<vmem>>, vector<8x512xf32>
      %c0_14 = arith.constant 0 : index
      %c0_15 = arith.constant 0 : index
      %18 = vector.load %arg4[%c0_14, %c0_15] : memref<1x512xf32, #tpu.memory_space<vmem>>, vector<1x512xf32>
      %19 = vector.broadcast %18 : vector<1x512xf32> to vector<8x512xf32>
      %20 = arith.addf %17, %19 : vector<8x512xf32>
      %cst_16 = arith.constant 0.000000e+00 : f32
      %21 = vector.broadcast %cst_16 : f32 to vector<8x512xf32>
      %22 = arith.maximumf %20, %21 : vector<8x512xf32>
      %23 = arith.truncf %22 : vector<8x512xf32> to vector<8x512xbf16>
      %c0_17 = arith.constant 0 : index
      %c0_18 = arith.constant 0 : index
      %24 = vector.load %arg5[%c0_17, %c0_18] : memref<512x256xbf16, #tpu.memory_space<vmem>>, vector<512x256xbf16>
      %cst_19 = arith.constant dense<0.000000e+00> : vector<8x256xf32>
      %25 = tpu.matmul %23, %24, %cst_19 {dimension_numbers = #tpu.dot_dimension_numbers<[1], [0], [0], [1], [0, 0, 1, 1], [], []>} : vector<8x512xbf16>, vector<512x256xbf16>, vector<8x256xf32> -> vector<8x256xf32>
      %c0_20 = arith.constant 0 : index
      %c0_21 = arith.constant 0 : index
      %26 = vector.load %arg6[%c0_20, %c0_21] : memref<1x256xf32, #tpu.memory_space<vmem>>, vector<1x256xf32>
      %27 = vector.broadcast %26 : vector<1x256xf32> to vector<8x256xf32>
      %28 = arith.addf %25, %27 : vector<8x256xf32>
      %cst_22 = arith.constant 0.000000e+00 : f32
      %29 = vector.broadcast %cst_22 : f32 to vector<8x256xf32>
      %30 = arith.maximumf %28, %29 : vector<8x256xf32>
      %31 = arith.truncf %30 : vector<8x256xf32> to vector<8x256xbf16>
      %c0_23 = arith.constant 0 : index
      %c0_24 = arith.constant 0 : index
      %32 = vector.load %arg7[%c0_23, %c0_24] : memref<256x128xbf16, #tpu.memory_space<vmem>>, vector<256x128xbf16>
      %cst_25 = arith.constant dense<0.000000e+00> : vector<8x128xf32>
      %33 = tpu.matmul %31, %32, %cst_25 {dimension_numbers = #tpu.dot_dimension_numbers<[1], [0], [0], [1], [0, 0, 1, 1], [], []>} : vector<8x256xbf16>, vector<256x128xbf16>, vector<8x128xf32> -> vector<8x128xf32>
      %c0_26 = arith.constant 0 : index
      %c0_27 = arith.constant 0 : index
      %34 = vector.load %arg8[%c0_26, %c0_27] : memref<1x128xf32, #tpu.memory_space<vmem>>, vector<1x128xf32>
      %35 = vector.broadcast %34 : vector<1x128xf32> to vector<8x128xf32>
      %36 = arith.addf %33, %35 : vector<8x128xf32>
      %c0_28 = arith.constant 0 : index
      %c0_29 = arith.constant 0 : index
      %37 = vector.load %arg9[%c0_28, %c0_29] : memref<8x128xf32, #tpu.memory_space<vmem>>, vector<8x128xf32>
      tpu.vector_store %arg9[%c0_28, %c0_29], %36 {strides = array<i32>} : memref<8x128xf32, #tpu.memory_space<vmem>>, vector<8x128xf32>,
    } else {
    }
    return
  }
  func.func @transform_0(%arg0: i32, %arg1: i32) -> (i32, i32, i32) {
    %c0_i32 = arith.constant 0 : i32
    %c0_i32_0 = arith.constant 0 : i32
    return %arg0, %c0_i32, %arg1 : i32, i32, i32
  }
  func.func @transform_1(%arg0: i32, %arg1: i32) -> (i32, i32) {
    %c0_i32 = arith.constant 0 : i32
    %c0_i32_0 = arith.constant 0 : i32
    return %arg1, %c0_i32 : i32, i32
  }
  func.func @transform_2(%arg0: i32, %arg1: i32) -> (i32, i32) {
    %c0_i32 = arith.constant 0 : i32
    %c0_i32_0 = arith.constant 0 : i32
    %c0_i32_1 = arith.constant 0 : i32
    return %c0_i32, %c0_i32_0 : i32, i32
  }
  func.func @transform_3(%arg0: i32, %arg1: i32) -> (i32, i32) {
    %c0_i32 = arith.constant 0 : i32
    %c0_i32_0 = arith.constant 0 : i32
    %c0_i32_1 = arith.constant 0 : i32
    return %c0_i32, %c0_i32_0 : i32, i32
  }
  func.func @transform_4(%arg0: i32, %arg1: i32) -> (i32, i32) {
    %c0_i32 = arith.constant 0 : i32
    %c0_i32_0 = arith.constant 0 : i32
    %c0_i32_1 = arith.constant 0 : i32
    return %c0_i32, %c0_i32_0 : i32, i32
  }
  func.func @transform_5(%arg0: i32, %arg1: i32) -> (i32, i32) {
    %c0_i32 = arith.constant 0 : i32
    %c0_i32_0 = arith.constant 0 : i32
    %c0_i32_1 = arith.constant 0 : i32
    return %c0_i32, %c0_i32_0 : i32, i32
  }
  func.func @transform_6(%arg0: i32, %arg1: i32) -> (i32, i32) {
    %c0_i32 = arith.constant 0 : i32
    %c0_i32_0 = arith.constant 0 : i32
    %c0_i32_1 = arith.constant 0 : i32
    return %c0_i32, %c0_i32_0 : i32, i32
  }
  func.func @transform_7(%arg0: i32, %arg1: i32) -> (i32, i32) {
    %c0_i32 = arith.constant 0 : i32
    %c0_i32_0 = arith.constant 0 : i32
    return %arg0, %c0_i32 : i32, i32
  }
}

</mosaic_0001>

<bundles_post_ra>
// kernel: tpu_custom_call.1
= control target key start
LH: loop header
LB: loop body
LE: loop exit
PB: predicated region body
PF: predicated region fallthrough
CT: control target
= control target key end

     0   :  { %s3417_s0 = inlined_call_operand.hbm [shape: bf16[16,64,256], index: 0, kind: input, shape index: {}]   ;;  %s3418_s1 = inlined_call_operand.hbm [shape: bf16[256,512], index: 1, kind: input, shape index: {}]   ;;  %s3419_s2 = inlined_call_operand.hbm [shape: f32[1,512], index: 2, kind: input, shape index: {}]   ;;  %s3420_s3 = inlined_call_operand.hbm [shape: bf16[512,256], index: 3, kind: input, shape index: {}]   ;;  %s3421_s4 = inlined_call_operand.vmem [shape: f32[1,256], index: 4, kind: input, shape index: {}]   ;;  %s3422_s5 = inlined_call_operand.hbm [shape: bf16[256,128], index: 5, kind: input, shape index: {}]   ;;  %s3423_s6 = inlined_call_operand.vmem [shape: f32[1,128], index: 6, kind: input, shape index: {}]   ;;  %s3424_s7 = inlined_call_operand.hbm [shape: f32[16,128], index: 7, kind: output, shape index: {}]  }
   0x1   :  { %3447 = sst [smem:[#allocation29_spill]] %s3417_s0 }
   0x2   :  { %3448 = sst [smem:[#allocation30_spill]] %s3419_s2 }
   0x3   :  { %3449 = sst [smem:[#allocation31_spill]] %s3420_s3 }
   0x4   :  { %3450 = sst [smem:[#allocation32_spill]] %s3421_s4 }
   0x5   :  { %3451 = sst [smem:[#allocation33_spill]] %s3422_s5 }
   0x6   :  { %3452 = sst [smem:[#allocation34_spill]] %s3423_s6 }
   0x7   :  { %3453 = sst [smem:[#allocation35_spill]] %s3424_s7 }
   0x8   :  { %12 = vsyncpa [#allocation4], 0 }
   0x9   :  { %14 = vsyncpa [#allocation4 + $0x1], 0 }
   0xa   :  { %15 = vsyncpa [#allocation7], 0 }
   0xb   :  { %17 = vsyncpa [#allocation7 + $0x1], 0 }
   0xc   :  { %18 = vsyncpa [#allocation10], 0 }
   0xd   :  { %19 = vsyncpa [#allocation5], 0 }
   0xe   :  { %21 = vsyncpa [#allocation5 + $0x1], 0  ;;  %s2821_s24 = smov 0   ;;  %s2823_s25 = smov 0  }
   0xf   :  { %s2825_s26 = smov 0   ;;  %s2827_s27 = smov 0  }
  0x10   :  { %s2829_s28 = smov 0   ;;  %s2831_s29 = smov 0  }
  0x11   :  { %s2833_s30 = smov 0   ;;  %s2835_s8 = smov 0  }
  0x12   :  { %s2837_s9 = smov 0   ;;  %s2839_s10 = smov 0  }
  0x13   :  { %s2841_s11 = smov 0   ;;  %s2843_s12 = smov 0  }
  0x14   :  { %s2845_s13 = smov 0   ;;  %s2847_s14 = smov 0  }
  0x15 LB: > { %3454 = sst [smem:[#allocation18_spill]] %s2713_s24  ;;  %s2888_s15 = sadd.s32 4294967295, %s2765_s14   ;;  %s2765_s14 = sphi %s2847_s14, %s27_s14   ;;  %s2761_s13 = sphi %s2845_s13, %s3537_s13   ;;  %s2757_s12 = sphi %s2843_s12, %s3547_s12   ;;  %s2753_s11 = sphi %s2841_s11, %s3535_s11   ;;  %s2749_s10 = sphi %s2839_s10, %s3546_s10   ;;  %s2745_s9 = sphi %s2837_s9, %s3545_s9   ;;  %s2741_s8 = sphi %s2835_s8, %s3544_s8   ;;  %s2737_s30 = sphi %s2833_s30, %s3543_s30   ;;  %s2733_s29 = sphi %s2831_s29, %s3542_s29   ;;  %s2729_s28 = sphi %s2829_s28, %s3541_s28   ;;  %s2725_s27 = sphi %s2827_s27, %s3540_s27   ;;  %s2721_s26 = sphi %s2825_s26, %s3539_s26   ;;  %s2717_s25 = sphi %s2823_s25, %s3538_s25   ;;  %s2713_s24 = sphi %s2821_s24, %s3533_s24  }
  0x16   : > { %3455 = sst [smem:[#allocation19_spill]] %s2717_s25  ;;  %s1821_s16 = sadd.s32 4294967294, %s2765_s14  }
  0x17   : > { %3456 = sst [smem:[#allocation20_spill]] %s2749_s10  ;;  %p61_p0 = scmp.ne.s32.totalorder %s2741_s8, %s2737_s30 }
  0x18   : > { %3457 = sst [smem:[#allocation21_spill]] %s2753_s11  ;;  %p3428_p1 = scmp.eq.s32.totalorder %s2888_s15, 0 }
  0x19   : > { %3458 = sst [smem:[#allocation22_spill]] %s2761_s13  ;;  %p87_p2 = scmp.ne.s32.totalorder %s2729_s28, %s2725_s27 }
  0x1a   : > { %3459 = sst [smem:[#allocation23_spill]] %s2888_s15  ;;  %p2897_p3 = por %p3428_p1, %p61_p0 }
  0x1b   : > { %p215_p4 = scmp.ne.s32.totalorder %s2721_s26, %s2717_s25  ;;  %p2905_p5 = por %p87_p2, %p3428_p1 }
  0x1c   : > { %s3460_s18 = scalar_select %p2897_p3, 1, 0 }
  0x1d   : > { %s3461_s19 = scalar_select %p2905_p5, 1, 0 }
  0x1e   : > { %p216_p6 = scmp.eq.s32.totalorder %s2888_s15, 3  ;;  %p221_p7 = scmp.ne.s32.totalorder %s2717_s25, %s2713_s24 }
  0x1f   : > { %3462 = sst [smem:[#allocation24_spill]] %s3461_s19  ;;  %p222_p8 = scmp.eq.s32.totalorder %s1821_s16, 3 }
  0x20   : > { %p2912_p9 = por %p216_p6, %p215_p4  ;;  %p1822_p10 = scmp.ge.s32.totalorder %s2765_s14, 1 }
  0x21   : > { %p2917_p11 = por %p222_p8, %p221_p7  ;;  %p229_p12 = scmp.lt.s32.totalorder %s2765_s14, 5 }
  0x22   : > { %s3463_s20 = scalar_select %p2912_p9, 1, 0 }
  0x23   : > { %s3465_s21 = scalar_select %p2917_p11, 1, 0 }
  0x24   : > { %3464 = sst [smem:[#allocation25_spill]] %s3463_s20  ;;  %p2922_p13 = pnand %p1822_p10, %p229_p12 }
  0x25   : > { %3466 = sst [smem:[#allocation26_spill]] %s3465_s21  ;;  %s2767_s23 = smov [#allocation8]  }
  0x26   : > { %s3467_s22 = scalar_select %p2922_p13, 1, 0 }
  0x27   : > { %s242_s27 = sshll.u32 %s2767_s23, 4  ;;  %p2163_p0 = pneg %p2922_p13  ;;  %s243_s27 = int_to_ptr.vmem [resolvable:$true] %s242_s27 }
  0x28   : > { %s2768_s30 = smov [#allocation9]   ;;  %s2769_s21 = smov [#allocation11]  }
  0x29   : > { %s252_s16 = sshll.u32 %s2768_s30, 4  ;;  %p2930_p2 = pnand %p2163_p0, %p3428_p1  ;;  %s253_s16 = int_to_ptr.vmem [resolvable:$true] %s252_s16 }
  0x2a   : > { %s268_s24 = sshll.u32 %s2769_s21, 4  ;;  %s2486_s7 = scalar_lea.vmem %s243_s27, 64  ;;  %s269_s24 = int_to_ptr.vmem [resolvable:$true] %s268_s24 }
  0x2b   : > { %p2477_p4 = pneg %p2930_p2  ;;  %p2487_p6 = scmp.ne.s32.totalorder %s243_s27, %s2486_s7 }
  0x2c   : > { %p2494_p10 = scmp.lt.s32.totalorder %s243_s27, %s243_s27  ;;  %p2495_p12 = scmp.lt.s32.totalorder %s2486_s7, %s2486_s7 }
  0x2d   : > { %p2489_p7 = pnand %p2487_p6, %p2477_p4 }
  0x2e   : > { %p2496_p11 = por %p2495_p12, %p2494_p10 }
  0x2f   : > { %p2490_p8 = pneg %p2489_p7 }
  0x31   : > { %p2497_p0 = pnand %p2496_p11, %p2490_p8 }
  0x33   : > { %2500 = shalt.err (!%p2497_p0)
}
  0x34   : > { %s3469_s2 = sld [smem:[#allocation30_spill]]  ;;  %s2512_s21 = scalar_lea.vmem %s253_s16, 8192 }
  0x35   : > { %p2513_p1 = scmp.ne.s32.totalorder %s253_s16, %s2512_s21  ;;  %p2520_p6 = scmp.lt.s32.totalorder %s253_s16, %s253_s16 }
  0x36   : > { %p2521_p7 = scmp.lt.s32.totalorder %s2512_s21, %s2512_s21 }
  0x37   : > { %p2515_p9 = pnand %p2513_p1, %p2477_p4 }
  0x38   : > { %p2522_p3 = por %p2521_p7, %p2520_p6 }
  0x39   : > { %p2516_p5 = pneg %p2515_p9 }
  0x3a   : > { %2166 = dma.hbm_to_vmem [thread:$0]  (!%p2930_p2), %s3469_s2, 64, %s243_s27, [#allocation7]  }
  0x3b   : > { %p2523_p13 = pnand %p2522_p3, %p2516_p5 }
  0x3d   : > { %2526 = shalt.err (!%p2523_p13)
}
  0x3e   : > { %s3435_s7 = smov 128   ;;  %s2771_s20 = smov 8  }
  0x3f   : > { %s3470_s3 = sld [smem:[#allocation31_spill]]  ;;  %s2538_s30 = scalar_lea.vmem %s269_s24, 2048 }
  0x40   : > { %p2539_p1 = scmp.ne.s32.totalorder %s269_s24, %s2538_s30  ;;  %p2546_p3 = scmp.lt.s32.totalorder %s269_s24, %s269_s24 }
  0x41   : > { %p2547_p5 = scmp.lt.s32.totalorder %s2538_s30, %s2538_s30 }
  0x42   : > { %p2541_p9 = pnand %p2539_p1, %p2477_p4 }
  0x43   : > { %p2548_p13 = por %p2547_p5, %p2546_p3 }
  0x44   : > { %p2542_p11 = pneg %p2541_p9 }
  0x45   : > { %2169 = dma.hbm_to_vmem [thread:$0]  (!%p2930_p2), %s3470_s3, 8192, %s253_s16, [#allocation10], %s3435_s7, %s3435_s7, %s2771_s20  }
  0x46   : > { %p2549_p8 = pnand %p2548_p13, %p2542_p11 }
  0x48   : > { %2552 = shalt.err (!%p2549_p8)
}
  0x49   : > { %s3436_s21 = smov 64   ;;  %s3437_s20 = smov 4  }
  0x4a   : > { %s3471_s5 = sld [smem:[#allocation33_spill]]  ;;  %s36_s27 = sadd.s32 1, %s2757_s12 }
  0x4b   : > { %p37_p4 = scmp.ge.s32.totalorder %s36_s27, 2  ;;  %s39_s30 = sadd.s32 1, %s2761_s13 }
  0x4c   : > { %s48_s7 = sadd.s32 1, %s2745_s9  ;;  %p55_p10 = scmp.ne.s32.totalorder %s2745_s9, %s2741_s8 }
  0x4d   : > { %s3549_s27 = smov (%p37_p4, %s36_s27), 0  ;;  %s3551_s30 = smov (!%p37_p4, %s39_s30), %s2761_s13 }
  0x4e   : > { %3472 = sst [smem:[#allocation27_spill]] %s3549_s27  ;;  %s2975_s17 = ssub.s32 %s2757_s12, %s3549_s27 }
  0x4f   : > { %p41_p12 = scmp.ge.s32.totalorder %s3551_s30, 2  ;;  %p72_p0 = scmp.eq.s32.totalorder %s2975_s17, 0 }
  0x50   : > { %2172 = dma.hbm_to_vmem [thread:$0]  (!%p2930_p2), %s3471_s5, 2048, %s269_s24, [#allocation10], %s3436_s21, %s3436_s21, %s3437_s20  }
  0x51   : > { %p56_p2 = scmp.eq.s32.totalorder %s2765_s14, 0  ;;  %p2187_p7 = scmp.lt.s32.totalorder %s2765_s14, 4 }
  0x52   : > { %s3553_s30 = smov (%p41_p12, %s3551_s30), 0  ;;  %s285_s16 = sand.u32 1, %s2745_s9  }
  0x53   : > { %p2981_p6 = por %p56_p2, %p55_p10  ;;  %3474 = sst [smem:[#allocation28_spill]] %s3553_s30 }
  0x54   : > { %s1961_s23 = sshll.u32 %s2761_s13, 7  ;;  %s43_s21 = ssub.s32 %s2761_s13, %s3553_s30 }
  0x55   : > { %s45_s20 = sor.u32 %s2975_s17, %s43_s21  ;;  %p203_p1 = scmp.eq.s32.totalorder %s43_s21, 0 }
  0x56   : > { %p46_p9 = scmp.eq.s32.totalorder %s45_s20, 0  ;;  %s1827_s2 = sshll.u32 %s285_s16, 8 }
  0x57   : > { %s3475_s3 = sadd.s32 1, %s2721_s26  ;;  %s295_s11 = sadd.s32 %s2757_s12, %s1961_s23 }
  0x58   : > { %s2996_s5 = scalar_select %p203_p1, %s2721_s26, %s3475_s3  }
  0x59   : > { %s2999_s27 = scalar_select %p46_p9, %s2745_s9, %s48_s7  }
  0x5a   : > { %s1830_s6 = sshll.u32 %s295_s11, 6  ;;  %s289_s4 = scalar_lea.vmem [#allocation3], %s1827_s2 }
  0x5b   : > { %s298_s10 = sshll.u32 %s289_s4, 4  ;;  %s3476_s0 = sld [smem:[#allocation29_spill]]  ;;  %s299_s10 = int_to_ptr.vmem [resolvable:$true] %s298_s10 }
  0x5c   : > { %p3009_p11 = pnand %p2187_p7, %p2981_p6  ;;  %s308_s3 = sand.u32 1, %s2765_s14  }
  0x5d   : > { %s74_s20 = sadd.s32 1, %s2733_s29  ;;  %s286_s7 = scalar_lea.sflag [#allocation4], %s285_s16 }
  0x5e   : > { %p2555_p3 = pneg %p3009_p11  ;;  %s2566_s11 = scalar_lea.vmem %s299_s10, 4096 }
  0x5f   : > { %p2567_p5 = scmp.ne.s32.totalorder %s299_s10, %s2566_s11  ;;  %s2774_s2 = smov [#allocation3]  }
  0x60   : > { %s2571_s4 = sshll.u32 %s2774_s2, 4  ;;  %s2572_s4 = int_to_ptr.vmem [resolvable:$false] %s2571_s4 }
  0x61   : > { %s297_s15 = scalar_lea.hbm %s3476_s0, %s1830_s6  ;;  %p2569_p13 = pnand %p2567_p5, %p2555_p3 }
  0x62   : > { %s2573_s6 = scalar_lea.vmem %s2572_s4, 8192  ;;  %p2574_p4 = scmp.lt.s32.totalorder %s299_s10, %s2572_s4 }
  0x63   : > { %p2570_p8 = pneg %p2569_p13  ;;  %p2575_p10 = scmp.lt.s32.totalorder %s2573_s6, %s2566_s11 }
  0x65   : > { %p2576_p12 = por %p2575_p10, %p2574_p4 }
  0x67   : > { %p2577_p6 = pnand %p2576_p12, %p2570_p8 }
  0x69   : > { %2580 = shalt.err (!%p2577_p6)
}
  0x6a   : > { %s3478_s25 = smov 4   ;;  %s3479_s19 = smov 64  }
  0x6b   : > { %s3480_s24 = smov 128   ;;  %p81_p1 = scmp.ne.s32.totalorder %s2733_s29, %s2729_s28 }
  0x6c   : > { %2176 = dma.hbm_to_vmem [thread:$0]  (!%p3009_p11), %s297_s15, 4096, %s299_s10, %s286_s7, %s3480_s24, %s3479_s19, %s3478_s25  }
  0x6d   : > { %s3025_s16 = scalar_select %p72_p0, %s2733_s29, %s74_s20  }
  0x6e   : > { %s310_s23 = sand.u32 1, %s2733_s29   ;;  %s1963_s11 = sshll.u32 %s2757_s12, 12 }
  0x6f   : > { %p83_p9 = por %p81_p1, %p56_p2  ;;  %s1831_s21 = sshll.u32 %s310_s23, 8 }
  0x70   : > { %s319_s6 = scalar_lea.hbm %s3418_s1, %s1963_s11  ;;  %s312_s0 = scalar_lea.vmem [#allocation6], %s1831_s21 }
  0x71   : > { %s320_s30 = sshll.u32 %s312_s0, 4  ;;  %p3038_p3 = pnand %p2187_p7, %p83_p9  ;;  %s321_s30 = int_to_ptr.vmem [resolvable:$true] %s320_s30 }
  0x72   : > { %s309_s10 = scalar_lea.sflag [#allocation7], %s308_s3  ;;  %s2594_s15 = scalar_lea.vmem %s321_s30, 4096 }
  0x73   : > { %p2583_p0 = pneg %p3038_p3  ;;  %p2595_p11 = scmp.ne.s32.totalorder %s321_s30, %s2594_s15 }
  0x74   : > { %s2775_s17 = smov [#allocation6]  }
  0x75   : > { %p2597_p2 = pnand %p2595_p11, %p2583_p0  ;;  %s2599_s20 = sshll.u32 %s2775_s17, 4  ;;  %s2600_s20 = int_to_ptr.vmem [resolvable:$false] %s2599_s20 }
  0x76   : > { %s2601_s7 = scalar_lea.vmem %s2600_s20, 8192  ;;  %p2602_p13 = scmp.lt.s32.totalorder %s321_s30, %s2600_s20 }
  0x77   : > { %p2598_p5 = pneg %p2597_p2  ;;  %p2603_p8 = scmp.lt.s32.totalorder %s2601_s7, %s2594_s15 }
  0x79   : > { %p2604_p4 = por %p2603_p8, %p2602_p13 }
  0x7b   : > { %p2605_p7 = pnand %p2604_p4, %p2598_p5 }
  0x7d   : > { %2608 = shalt.err (!%p2605_p7)
}
  0x7e   : > { %s2776_s0 = smov 256   ;;  %s2777_s25 = smov 16  }
  0x7f   : > { %2179 = dma.hbm_to_vmem [thread:$0]  (!%p3038_p3), %s319_s6, 4096, %s321_s30, %s309_s10, %s2776_s0, %s2776_s0, %s2777_s25  }
  0x80   : > { %p3482_p10 = scmp.ne.s32.totalorder %s3467_s22, 0 }
  0x81   : > { %s334_s3 = sand.u32 (!%p3482_p10), 1, %s2741_s8   ;;  %p3483_p12 = scmp.ne.s32.totalorder (!%p3482_p10), %s3460_s18, 0 }
  0x82   : > { %332 = sbr.rel (%p3482_p10) target bundleno = 940 (0x3ac), region = 48  ;;  %s1836_s19 = sshll.u32 (!%p3482_p10), %s334_s3, 8 }
  0x83   : > { %s335_s24 = scalar_lea.sflag (!%p3482_p10), [#allocation4], %s334_s3  ;;  %s3049_s23 = scalar_lea.vmem (!%p3482_p10), [#allocation3], %s1836_s19 }
  0x87   : > { %2692 = dma.done.wait (%p3483_p12), %s335_s24, 4096  }
  0x88   : > { %2694 = vsyncadd (%p3483_p12), %s335_s24, 4294963200  ;;  %s3484_s11 = sld [smem:[#allocation23_spill]]  ;;  %s345_s30 = sand.u32 1, %s2729_s28  }
  0x89   : > { %s3485_s21 = sld [smem:[#allocation24_spill]]  ;;  %s1837_s2 = sshll.u32 %s345_s30, 8 }
  0x8a   : > { %s3057_s4 = scalar_lea.vmem [#allocation6], %s1837_s2 }
  0x8e   : > { %s343_s13 = sand.u32 1, %s3484_s11  }
  0x8f   : > { %s344_s22 = scalar_lea.sflag [#allocation7], %s343_s13  ;;  %p3486_p6 = scmp.ne.s32.totalorder %s3485_s21, 0 }
  0x91   : > { %2696 = dma.done.wait (%p3486_p6), %s344_s22, 4096  }
  0x92   : > { %2698 = vsyncadd (%p3486_p6), %s344_s22, 4294963200  ;;  %p3487_p1 = scmp.eq.s32.totalorder %s3484_s11, 0 }
  0x94   : > { %2700 = dma.done.wait (%p3487_p1), [#allocation7], 64   ;;  %p3488_p9 = pmov %p3487_p1 }
  0x95   : > { %p3489_p3 = pmov %p3487_p1 }
  0x96   : > { %2702 = vsyncadd (%p3488_p9), [#allocation7], 4294967232 }
  0x97   : > { %2704 = dma.done.wait (%p3489_p3), [#allocation10], 10240   ;;  %p3490_p0 = pmov %p3487_p1 }
  0x98   : > { %s3491_s18 = sld [smem:[#allocation19_spill]] }
  0x99   : > { %2706 = vsyncadd (%p3490_p0), [#allocation10], 4294957056  ;;  %s3492_s17 = sld [smem:[#allocation20_spill]] }
  0x9e   : > { %s392_s6 = sand.u32 1, %s3491_s18  }
  0x9f   : > { %s3074_s10 = sshll.u32 %s392_s6, 3  ;;  %p1842_p11 = scmp.ne.s32.totalorder %s3492_s17, 0 }
  0xa0   : > { %s394_s15 = scalar_lea.vmem [#allocation12], %s3074_s10 }
  0xa1   : > { %401 = sbr.rel (%p1842_p11) target bundleno = 169 (0xa9), region = 72 }
  0xa6   : > { %v2778_v0 = vmov 0.0  }
  0xa7   : > { %402 = vst [vmem:[#allocation2 + $0x10] sm:$0xff] %v2778_v0  ;;  %403 = vst [vmem:[#allocation2] sm:$0xff] %v2778_v0 }
  0xa8   : > { %404 = vst [vmem:[#allocation2 + $0x18] sm:$0xff] %v2778_v0  ;;  %405 = vst [vmem:[#allocation2 + $0x8] sm:$0xff] %v2778_v0 }
  0xa9 PF: > { %v2315_v1 = vld [vmem:[%s3057_s4 + $0xe4] ss:$16 sps:$4 sm:$0xff]   ;;  %v2317_v2 = vld [vmem:[%s3057_s4 + $0xec] ss:$16 sps:$4 sm:$0xff]   ;;  %v2779_v3 = vmov 0   ;;  %vm706_vm0 = vcmask 1041409  }
  0xaa   : > { %914 = vmatprep.mubr.bf16.mxu0 %v2779_v3  ;;  %955 = vmatprep.mubr.bf16.mxu1 %v2779_v3  ;;  %v2319_v4 = vld [vmem:[%s3057_s4 + $0xe0] ss:$16 sps:$4 sm:$0xff]   ;;  %v2320_v5 = vld [vmem:[%s3057_s4 + $0xe8] ss:$16 sps:$4 sm:$0xff]   ;;  %v2321_v6 = vld [vmem:[%s3057_s4 + $0xc4] ss:$16 sps:$4 sm:$0xff]  }
  0xab   : > { %882 = vmatprep.subr.bf16.mxu0 %v2315_v1  ;;  %923 = vmatprep.subr.bf16.mxu1 %v2317_v2  ;;  %v2323_v7 = vld [vmem:[%s3057_s4 + $0xcc] ss:$16 sps:$4 sm:$0xff]   ;;  %v2325_v8 = vld [vmem:[%s3057_s4 + $0xc0] ss:$16 sps:$4 sm:$0xff]   ;;  %v2326_v9 = vld [vmem:[%s3057_s4 + $0xc8] ss:$16 sps:$4 sm:$0xff]  }
  0xac   : > { %883 = vmatpush1.bf16.msra.mxu0 %v2319_v4  ;;  %924 = vmatpush1.bf16.msra.mxu1 %v2320_v5  ;;  %v2327_v10 = vld [vmem:[%s3057_s4 + $0xa4] ss:$16 sps:$4 sm:$0xff]   ;;  %v2329_v11 = vld [vmem:[%s3057_s4 + $0xac] ss:$16 sps:$4 sm:$0xff]   ;;  %v2331_v12 = vld [vmem:[%s3057_s4 + $0xa0] ss:$16 sps:$4 sm:$0xff]  }
  0xad   : > { %884 = vmatprep.subr.bf16.mxu0 %v2321_v6  ;;  %925 = vmatprep.subr.bf16.mxu1 %v2323_v7  ;;  %v2332_v13 = vld [vmem:[%s3057_s4 + $0xa8] ss:$16 sps:$4 sm:$0xff]   ;;  %v2333_v14 = vld [vmem:[%s3057_s4 + $0x84] ss:$16 sps:$4 sm:$0xff]   ;;  %v2335_v15 = vld [vmem:[%s3057_s4 + $0x8c] ss:$16 sps:$4 sm:$0xff]  }
  0xae   : > { %v2337_v16 = vld [vmem:[%s3057_s4 + $0x80] ss:$16 sps:$4 sm:$0xff]   ;;  %v2338_v17 = vld [vmem:[%s3057_s4 + $0x88] ss:$16 sps:$4 sm:$0xff]   ;;  %v2339_v18 = vld [vmem:[%s3057_s4 + $0x64] ss:$16 sps:$4 sm:$0xff]  }
  0xaf   : > { %v2341_v19 = vld [vmem:[%s3057_s4 + $0x6c] ss:$16 sps:$4 sm:$0xff]   ;;  %v2343_v20 = vld [vmem:[%s3057_s4 + $0x60] ss:$16 sps:$4 sm:$0xff]   ;;  %v2344_v21 = vld [vmem:[%s3057_s4 + $0x68] ss:$16 sps:$4 sm:$0xff]  }
  0xb0   : > { %885 = vmatpush1.bf16.msra.mxu0 %v2325_v8  ;;  %926 = vmatpush1.bf16.msra.mxu1 %v2326_v9  ;;  %v2345_v22 = vld [vmem:[%s3057_s4 + $0x44] ss:$16 sps:$4 sm:$0xff]   ;;  %v2347_v23 = vld [vmem:[%s3057_s4 + $0x4c] ss:$16 sps:$4 sm:$0xff]   ;;  %v2349_v24 = vld [vmem:[%s3057_s4 + $0x40] ss:$16 sps:$4 sm:$0xff]  }
  0xb1   : > { %886 = vmatprep.subr.bf16.mxu0 %v2327_v10  ;;  %927 = vmatprep.subr.bf16.mxu1 %v2329_v11  ;;  %v2350_v25 = vld [vmem:[%s3057_s4 + $0x48] ss:$16 sps:$4 sm:$0xff]   ;;  %v2351_v26 = vld [vmem:[%s3057_s4 + $0x24] ss:$16 sps:$4 sm:$0xff]   ;;  %v2353_v27 = vld [vmem:[%s3057_s4 + $0x2c] ss:$16 sps:$4 sm:$0xff]  }
  0xb2   : > { %v3105_v28 = vld [vmem:[%s3049_s23] sm:$0xff]   ;;  %v3108_v29 = vld [vmem:[%s3049_s23 + $0x8] sm:$0xff]   ;;  %v3117_v36 = vld [vmem:[%s3049_s23 + $0x10] sm:$0xff]   ;;  %vm708_vm1 = vcmask 1042434   ;;  %vm710_vm2 = vcmask 1043459   ;;  %vm712_vm3 = vcmask 1044484  }
  0xb3   : > { %v2355_v30 = vld [vmem:[%s3057_s4 + $0x20] ss:$16 sps:$4 sm:$0xff]   ;;  %v2356_v31 = vld [vmem:[%s3057_s4 + $0x28] ss:$16 sps:$4 sm:$0xff]   ;;  %v1966_v32 = vunpack.c.l.bf16 %v3105_v28  ;;  %v1967_v33 = vunpack.c.h.bf16 %v3105_v28  ;;  %v1970_v34 = vunpack.c.l.bf16 %v3108_v29  ;;  %v2357_v39 = vld [vmem:[%s3057_s4 + $0x4] ss:$16 sps:$4 sm:$0xff]  }
  0xb4   : > { %887 = vmatpush1.bf16.msra.mxu0 %v2331_v12  ;;  %928 = vmatpush1.bf16.msra.mxu1 %v2332_v13  ;;  %v3120_v37 = vld [vmem:[%s3049_s23 + $0x18] sm:$0xff]   ;;  %v3123_v38 = vld [vmem:[%s3049_s23 + $0x20] sm:$0xff]   ;;  %v3132_v45 = vld [vmem:[%s3049_s23 + $0x28] sm:$0xff]   ;;  %vm714_vm4 = vcmask 1045509   ;;  %vm716_vm5 = vcmask 1046534   ;;  %vm718_vm6 = vcmask 1047559  }
  0xb5   : > { %888 = vmatprep.subr.bf16.mxu0 %v2333_v14  ;;  %929 = vmatprep.subr.bf16.mxu1 %v2335_v15  ;;  %v2359_v40 = vld [vmem:[%s3057_s4 + $0xc] ss:$16 sps:$4 sm:$0xff]   ;;  %v3135_v46 = vld [vmem:[%s3049_s23 + $0x30] sm:$0xff]   ;;  %v1982_v48 = vunpack.c.l.bf16 %v3123_v38  ;;  %v1983_v49 = vunpack.c.h.bf16 %v3123_v38  ;;  %v1986_v50 = vunpack.c.l.bf16 %v3132_v45  ;;  %v3145_v52 = vld [vmem:[%s3049_s23 + $0x40] sm:$0xff]   ;;  %v534_v51 = vadd.f32 %v1967_v33, %v1966_v32  ;;  %s3521_s20 = sld [smem:[#allocation20_spill]] }
  0xb6   : > { %v3138_v47 = vld [vmem:[%s3049_s23 + $0x38] sm:$0xff]   ;;  %v3148_v53 = vld [vmem:[%s3049_s23 + $0x48] sm:$0xff]   ;;  %v3151_v54 = vld [vmem:[%s3049_s23 + $0x50] sm:$0xff]   ;;  %v1998_v62 = vunpack.c.l.bf16 %v3145_v52  ;;  %v1999_v63 = vunpack.c.h.bf16 %v3145_v52 }
  0xb7   : > { %v3158_v59 = vld [vmem:[%s3049_s23 + $0x58] sm:$0xff]   ;;  %v3161_v60 = vld [vmem:[%s3049_s23 + $0x60] sm:$0xff]   ;;  %v3164_v61 = vld [vmem:[%s3049_s23 + $0x68] sm:$0xff]   ;;  %v2002_v0 = vunpack.c.l.bf16 %v3148_v53  ;;  %v535_v14 = vadd.f32 %v1970_v34, %v534_v51  ;;  %v3496_v34 = vunpack.c.h.bf16 %v3148_v53 }
  0xb8   : > { %889 = vmatpush1.bf16.msra.mxu0 %v2337_v16  ;;  %930 = vmatpush1.bf16.msra.mxu1 %v2338_v17  ;;  %v3171_v2 = vld [vmem:[%s3049_s23 + $0x70] sm:$0xff]   ;;  %v3174_v3 = vld [vmem:[%s3049_s23 + $0x78] sm:$0xff]   ;;  %v3182_v9 = vld [vmem:[%s3049_s23 + $0x80] sm:$0xff]   ;;  %v2014_v12 = vunpack.c.l.bf16 %v3161_v60  ;;  %v2015_v13 = vunpack.c.h.bf16 %v3161_v60  ;;  %v3493_v33 = vunpack.c.l.bf16 %v3164_v61 }
  0xb9   : > { %890 = vmatprep.subr.bf16.mxu0 %v2339_v18  ;;  %931 = vmatprep.subr.bf16.mxu1 %v2341_v19  ;;  %v2361_v4 = vld [vmem:[%s3057_s4] ss:$16 sps:$4 sm:$0xff]   ;;  %v3185_v10 = vld [vmem:[%s3049_s23 + $0x88] sm:$0xff]   ;;  %v3196_v17 = vld [vmem:[%s3049_s23 + $0x98] sm:$0xff]  }
  0xba   : > { %v2362_v11 = vld [vmem:[%s3057_s4 + $0x8] ss:$16 sps:$4 sm:$0xff]   ;;  %v3193_v16 = vld [vmem:[%s3049_s23 + $0x90] sm:$0xff]  }
  0xbb   : > { %v2116_v8 = vld [vmem:[%s3049_s23 + $0xc8] sm:$0xff]   ;;  %v3225_v7 = vld [vmem:[%s3049_s23 + $0xd0] sm:$0xff]   ;;  %v3228_v57 = vld [vmem:[%s3049_s23 + $0xd8] sm:$0xff]   ;;  %p1875_p2 = scmp.ne.s32.totalorder %s3521_s20, 1 }
  0xbc   : > { %891 = vmatpush1.bf16.msra.mxu0 %v2343_v20  ;;  %932 = vmatpush1.bf16.msra.mxu1 %v2344_v21  ;;  %v2066_v6 = vunpack.c.l.bf16 %v2116_v8  ;;  %v2067_v56 = vunpack.c.h.bf16 %v2116_v8  ;;  %v2121_v42 = vld [vmem:[%s3049_s23 + $0xf0] sm:$0xff]   ;;  %v2071_v18 = vunpack.c.h.bf16 %v3225_v7  ;;  %v2074_v5 = vunpack.c.l.bf16 %v3228_v57  ;;  %s3522_s25 = sld [smem:[#allocation32_spill]] (!%p1875_p2) }
  0xbd   : > { %892 = vmatprep.subr.bf16.mxu0 %v2345_v22  ;;  %933 = vmatprep.subr.bf16.mxu1 %v2347_v23  ;;  %v2111_v22 = vld [vmem:[%s3049_s23 + $0xa0] sm:$0xff]   ;;  %v3204_v23 = vld [vmem:[%s3049_s23 + $0xa8] sm:$0xff]   ;;  %v2086_v15 = vunpack.c.l.bf16 %v2121_v42  ;;  %v2087_v1 = vunpack.c.h.bf16 %v2121_v42  ;;  %v573_v42 = vadd.f32 %v2015_v13, %v2014_v12  ;;  %s3523_s24 = sld [smem:[#allocation34_spill]] (!%p1875_p2) }
  0xbe   : > { %v2047_v58 = vunpack.c.h.bf16 %v2111_v22  ;;  %v2050_v44 = vunpack.c.l.bf16 %v3204_v23  ;;  %v2051_v20 = vunpack.c.h.bf16 %v3204_v23  ;;  %v3238_v23 = vld [vmem:[%s3049_s23 + $0xf8] sm:$0xff]  }
  0xbf   : > { %v2091_v8 = vunpack.c.h.bf16 %v3238_v23  ;;  %v574_v38 = vadd.f32 %v3493_v33, %v573_v42 }
  0xc0   : > { %893 = vmatpush1.bf16.msra.mxu0 %v2349_v24  ;;  %934 = vmatpush1.bf16.msra.mxu1 %v2350_v25  ;;  %v2030_v24 = vunpack.c.l.bf16 %v3182_v9  ;;  %v2031_v25 = vunpack.c.h.bf16 %v3182_v9  ;;  %v2115_v9 = vld [vmem:[%s3049_s23 + $0xc0] sm:$0xff]  }
  0xc1   : > { %894 = vmatprep.subr.bf16.mxu0 %v2351_v26  ;;  %935 = vmatprep.subr.bf16.mxu1 %v2353_v27  ;;  %v2034_v26 = vunpack.c.l.bf16 %v3185_v10  ;;  %v2035_v27 = vunpack.c.h.bf16 %v3185_v10  ;;  %v2046_v10 = vunpack.c.l.bf16 %v2111_v22  ;;  %v2062_v22 = vunpack.c.l.bf16 %v2115_v9 }
  0xc2   : > { %v2063_v19 = vunpack.c.h.bf16 %v2115_v9  ;;  %v2090_v9 = vunpack.c.l.bf16 %v3238_v23 }
  0xc4   : > { %895 = vmatpush1.bf16.msra.mxu0 %v2355_v30  ;;  %936 = vmatpush1.bf16.msra.mxu1 %v2356_v31  ;;  %v3211_v30 = vld [vmem:[%s3049_s23 + $0xb0] sm:$0xff]   ;;  %v3214_v31 = vld [vmem:[%s3049_s23 + $0xb8] sm:$0xff]   ;;  %v612_v35 = vadd.f32 %v2063_v19, %v2062_v22 }
  0xc5   : > { %896 = vmatprep.subr.bf16.mxu0 %v2357_v39  ;;  %937 = vmatprep.subr.bf16.mxu1 %v2359_v40  ;;  %v2054_v60 = vunpack.c.l.bf16 %v3211_v30  ;;  %v2055_v21 = vunpack.c.h.bf16 %v3211_v30  ;;  %v2120_v40 = vld [vmem:[%s3049_s23 + $0xe8] sm:$0xff]   ;;  %v2070_v39 = vunpack.c.l.bf16 %v3225_v7  ;;  %v547_v7 = vadd.f32 %v1983_v49, %v1982_v48 }
  0xc6   : > { %v2083_v41 = vunpack.c.h.bf16 %v2120_v40  ;;  %v599_v30 = vadd.f32 %v2047_v58, %v2046_v10  ;;  %v613_v52 = vadd.f32 %v2066_v6, %v612_v35  ;;  %v3494_v58 = vunpack.c.h.bf16 %v3108_v29 }
  0xc7   : > { %v548_v28 = vadd.f32 %v1986_v50, %v547_v7  ;;  %v3497_v50 = vunpack.c.h.bf16 %v3164_v61  ;;  %v3499_v6 = vunpack.c.l.bf16 %v3135_v46 }
  0xc8   : > { %897 = vmatpush1.bf16.msra.mxu0 %v2361_v4  ;;  %938 = vmatpush1.bf16.msra.mxu1 %v2362_v11  ;;  %v2119_v11 = vld [vmem:[%s3049_s23 + $0xe0] sm:$0xff]   ;;  %v2082_v4 = vunpack.c.l.bf16 %v2120_v40  ;;  %v560_v40 = vadd.f32 %v1999_v63, %v1998_v62  ;;  %v600_v49 = vadd.f32 %v2050_v44, %v599_v30  ;;  %v536_v63 = vadd.f32 %v3494_v58, %v535_v14 }
  0xc9   : > { %v2078_v43 = vunpack.c.l.bf16 %v2119_v11  ;;  %v2079_v55 = vunpack.c.h.bf16 %v2119_v11  ;;  %v586_v11 = vadd.f32 %v2031_v25, %v2030_v24  ;;  %v575_v12 = vadd.f32 %v3497_v50, %v574_v38 }
  0xca   : > { %v561_v32 = vadd.f32 %v2002_v0, %v560_v40  ;;  %v601_v13 = vadd.f32 %v2051_v20, %v600_v49  ;;  %v614_v19 = vadd.f32 %v2067_v56, %v613_v52  ;;  %v3498_v44 = vunpack.c.l.bf16 %v3117_v36 }
  0xcb   : > { %v625_v23 = vadd.f32 %v2079_v55, %v2078_v43  ;;  %v587_v48 = vadd.f32 %v2034_v26, %v586_v11  ;;  %v3495_v43 = vunpack.c.h.bf16 %v3132_v45  ;;  %v3500_v14 = vunpack.c.l.bf16 %v3151_v54 }
  0xcc   : > { %v562_v51 = vadd.f32 %v3496_v34, %v561_v32  ;;  %v537_v35 = vadd.f32 %v3498_v44, %v536_v63  ;;  %v3501_v25 = vunpack.c.l.bf16 %v3171_v2  ;;  %v3502_v26 = vunpack.c.l.bf16 %v3193_v16 }
  0xcd   : > { %v626_v62 = vadd.f32 %v2082_v4, %v625_v23  ;;  %v549_v55 = vadd.f32 %v3495_v43, %v548_v28  ;;  %v588_v0 = vadd.f32 %v2035_v27, %v587_v48  ;;  %v602_v10 = vadd.f32 %v2054_v60, %v601_v13 }
  0xce   : > { %v563_v45 = vadd.f32 %v3500_v14, %v562_v51  ;;  %v576_v53 = vadd.f32 %v3501_v25, %v575_v12  ;;  %v615_v27 = vadd.f32 %v2070_v39, %v614_v19  ;;  %v3504_v4 = vunpack.c.h.bf16 %v3135_v46 }
  0xcf   : > { %v627_v24 = vadd.f32 %v2083_v41, %v626_v62  ;;  %v550_v29 = vadd.f32 %v3499_v6, %v549_v55  ;;  %v589_v61 = vadd.f32 %v3502_v26, %v588_v0  ;;  %v3503_v41 = vunpack.c.h.bf16 %v3117_v36 }
  0xd0   : > { %v3505_v30 = vunpack.c.h.bf16 %v3151_v54  ;;  %v3506_v40 = vunpack.c.h.bf16 %v3171_v2  ;;  %v3507_v11 = vunpack.c.h.bf16 %v3193_v16  ;;  %v603_v28 = vadd.f32 %v2055_v21, %v602_v10 }
  0xd1   : > { %v628_v20 = vadd.f32 %v2086_v15, %v627_v24  ;;  %v538_v56 = vadd.f32 %v3503_v41, %v537_v35  ;;  %v551_v22 = vadd.f32 %v3504_v4, %v550_v29  ;;  %v616_v32 = vadd.f32 %v2071_v18, %v615_v27 }
  0xd2   : > { %v564_v7 = vadd.f32 %v3505_v30, %v563_v45  ;;  %v577_v42 = vadd.f32 %v3506_v40, %v576_v53  ;;  %v590_v23 = vadd.f32 %v3507_v11, %v589_v61  ;;  %v3508_v15 = vunpack.c.l.bf16 %v3120_v37 }
  0xd3   : > { %v629_v60 = vadd.f32 %v2087_v1, %v628_v20  ;;  %v3509_v36 = vunpack.c.l.bf16 %v3138_v47  ;;  %v3510_v46 = vunpack.c.l.bf16 %v3158_v59  ;;  %v3511_v54 = vunpack.c.l.bf16 %v3174_v3 }
  0xd4   : > { %v539_v39 = vadd.f32 %v3508_v15, %v538_v56  ;;  %v3512_v2 = vunpack.c.l.bf16 %v3196_v17  ;;  %v3513_v16 = vunpack.c.l.bf16 %v3214_v31  ;;  %v617_v18 = vadd.f32 %v2074_v5, %v616_v32 }
  0xd5   : > { %v552_v33 = vadd.f32 %v3509_v36, %v551_v22  ;;  %v565_v38 = vadd.f32 %v3510_v46, %v564_v7  ;;  %v578_v48 = vadd.f32 %v3511_v54, %v577_v42  ;;  %v630_v1 = vadd.f32 %v2090_v9, %v629_v60 }
  0xd6   : > { %v591_v49 = vadd.f32 %v3512_v2, %v590_v23  ;;  %v604_v21 = vadd.f32 %v3513_v16, %v603_v28  ;;  %v3514_v52 = vunpack.c.h.bf16 %v3120_v37  ;;  %v3515_v58 = vunpack.c.h.bf16 %v3138_v47 }
  0xd7   : > { %v3516_v43 = vunpack.c.h.bf16 %v3158_v59  ;;  %v3517_v34 = vunpack.c.h.bf16 %v3174_v3  ;;  %v3518_v50 = vunpack.c.h.bf16 %v3196_v17  ;;  %v3519_v0 = vunpack.c.h.bf16 %v3214_v31 }
  0xd8   : > { %v540_v62 = vadd.f32 %v3514_v52, %v539_v39  ;;  %v553_v63 = vadd.f32 %v3515_v58, %v552_v33  ;;  %v3520_v5 = vunpack.c.h.bf16 %v3228_v57  ;;  %v631_v37 = vadd.f32 %v2091_v8, %v630_v1 }
  0xd9   : > { %v566_v55 = vadd.f32 %v3516_v43, %v565_v38  ;;  %v579_v51 = vadd.f32 %v3517_v34, %v578_v48  ;;  %v592_v12 = vadd.f32 %v3518_v50, %v591_v49  ;;  %v605_v13 = vadd.f32 %v3519_v0, %v604_v21 }
  0xda   : > { %v618_v9 = vadd.f32 %v3520_v5, %v617_v18  ;;  %v541_v19 = vrot.slane %v540_v62, 4  ;;  %v554_v24 = vrot.slane %v553_v63, 4  ;;  %v632_v29 = vrot.slane %v631_v37, 4 }
  0xdb   : > { %v567_v47 = vrot.slane %v566_v55, 4  ;;  %v580_v44 = vrot.slane %v579_v51, 4  ;;  %v593_v35 = vrot.slane %v592_v12, 4  ;;  %v606_v59 = vrot.slane %v605_v13, 4 }
  0xdc   : > { %v619_v6 = vrot.slane %v618_v9, 4  ;;  %v542_v3 = vadd.f32 %v541_v19, %v540_v62  ;;  %v555_v14 = vadd.f32 %v554_v24, %v553_v63  ;;  %v633_v26 = vadd.f32 %v632_v29, %v631_v37 }
  0xdd   : > { %v568_v45 = vadd.f32 %v567_v47, %v566_v55  ;;  %v581_v17 = vadd.f32 %v580_v44, %v579_v51  ;;  %v594_v25 = vadd.f32 %v593_v35, %v592_v12  ;;  %v607_v53 = vadd.f32 %v606_v59, %v605_v13 }
  0xde   : > { %v620_v31 = vadd.f32 %v619_v6, %v618_v9  ;;  %v543_v61 = vrot.slane %v542_v3, 2  ;;  %v556_v57 = vrot.slane %v555_v14, 2  ;;  %v634_v56 = vrot.slane %v633_v26, 2 }
  0xdf   : > { %v569_v10 = vrot.slane %v568_v45, 2  ;;  %v582_v8 = vrot.slane %v581_v17, 2  ;;  %v595_v27 = vrot.slane %v594_v25, 2  ;;  %v608_v20 = vrot.slane %v607_v53, 2 }
  0xe0   : > { %v621_v41 = vrot.slane %v620_v31, 2  ;;  %v544_v4 = vadd.f32 %v543_v61, %v542_v3  ;;  %v557_v22 = vadd.f32 %v556_v57, %v555_v14  ;;  %v635_v23 = vadd.f32 %v634_v56, %v633_v26  ;;  %v646_v61 = vld [vmem:[#allocation2 + $0x10] sm:$0xff]  ;;  %v648_v57 = vld [vmem:[#allocation2 + $0x18] sm:$0xff] }
  0xe1   : > { %v570_v30 = vadd.f32 %v569_v10, %v568_v45  ;;  %v583_v7 = vadd.f32 %v582_v8, %v581_v17  ;;  %v596_v40 = vadd.f32 %v595_v27, %v594_v25  ;;  %v609_v42 = vadd.f32 %v608_v20, %v607_v53  ;;  %v647_v27 = vld [vmem:[#allocation2] sm:$0xff]  ;;  %v649_v20 = vld [vmem:[#allocation2 + $0x8] sm:$0xff] }
  0xe2   : > { %v622_v11 = vadd.f32 %v621_v41, %v620_v31  ;;  %v545_v28 = vrot.slane %v544_v4, 1  ;;  %v558_v32 = vrot.slane %v557_v22, 1  ;;  %v636_v46 = vrot.slane %v635_v23, 1 }
  0xe3   : > { %v571_v60 = vrot.slane %v570_v30, 1  ;;  %v584_v15 = vrot.slane %v583_v7, 1  ;;  %v597_v39 = vrot.slane %v596_v40, 1  ;;  %v610_v36 = vrot.slane %v609_v42, 1 }
  0xe4   : > { %v623_v33 = vrot.slane %v622_v11, 1  ;;  %v546_v38 = vadd.f32 %v545_v28, %v544_v4  ;;  %v559_v54 = vadd.f32 %v558_v32, %v557_v22  ;;  %v637_v18 = vadd.f32 %v636_v46, %v635_v23 }
  0xe5   : > { %v572_v48 = vadd.f32 %v571_v60, %v570_v30  ;;  %v585_v2 = vadd.f32 %v584_v15, %v583_v7  ;;  %v598_v49 = vadd.f32 %v597_v39, %v596_v40  ;;  %v611_v16 = vadd.f32 %v610_v36, %v609_v42 }
  0xe6   : > { %v624_v21 = vadd.f32 %v623_v33, %v622_v11  ;;  %v638_v1 = vmul.f32 0.015625, %v546_v38  ;;  %v639_v52 = vmul.f32 0.015625, %v559_v54  ;;  %v645_v34 = vmul.f32 0.015625, %v637_v18 }
  0xe7   : > { %v640_v62 = vmul.f32 0.015625, %v572_v48  ;;  %v641_v58 = vmul.f32 0.015625, %v585_v2  ;;  %v642_v63 = vmul.f32 0.015625, %v598_v49  ;;  %v643_v43 = vmul.f32 0.015625, %v611_v16 }
  0xe8   : > { %v644_v55 = vmul.f32 0.015625, %v624_v21  ;;  %v650_v51 = vpack.c.bf16 %v638_v1, %v638_v1  ;;  %v651_v50 = vpack.c.bf16 %v639_v52, %v639_v52  ;;  %v657_v37 = vpack.c.bf16 %v645_v34, %v645_v34 }
  0xe9   : > { %v652_v12 = vpack.c.bf16 %v640_v62, %v640_v62  ;;  %v653_v0 = vpack.c.bf16 %v641_v58, %v641_v58  ;;  %v654_v13 = vpack.c.bf16 %v642_v63, %v642_v63  ;;  %v655_v5 = vpack.c.bf16 %v643_v43, %v643_v43 }
  0xea   : > { %v656_v9 = vpack.c.bf16 %v644_v55, %v644_v55  ;;  %v698_v19 = vunpack.c.l.b16 %v650_v51  ;;  %v699_v24 = vunpack.c.l.b16 %v651_v50  ;;  %v705_v14 = vunpack.c.l.b16 %v657_v37 }
  0xeb   : > { %v700_v47 = vunpack.c.l.b16 %v652_v12  ;;  %v701_v44 = vunpack.c.l.b16 %v653_v0  ;;  %v702_v35 = vunpack.c.l.b16 %v654_v13  ;;  %v703_v59 = vunpack.c.l.b16 %v655_v5 }
  0xec   : > { %v707_v6 = vsel %vm706_vm0, %v699_v24, %v698_v19  ;;  %v704_v29 = vunpack.c.l.b16 %v656_v9 }
  0xed   : > { %v709_v3 = vsel %vm708_vm1, %v700_v47, %v707_v6 }
  0xee   : > { %v711_v45 = vsel %vm710_vm2, %v701_v44, %v709_v3 }
  0xef   : > { %v713_v17 = vsel %vm712_vm3, %v702_v35, %v711_v45 }
  0xf0   : > { %v715_v25 = vsel %vm714_vm4, %v703_v59, %v713_v17 }
  0xf1   : > { %v717_v53 = vsel %vm716_vm5, %v704_v29, %v715_v25 }
  0xf2   : > { %v719_v31 = vsel %vm718_vm6, %v705_v14, %v717_v53 }
  0xf3   : > { %v720_v26 = vpack.c.b16 %v719_v31, %v719_v31 }
  0xf5   : > { %915 = vmatmul.mubr.bf16.vlgmr.msra.gmra.mxu0 %v720_v26  ;;  %956 = vmatmul.mubr.bf16.vlgmr.msra.gmra.mxu1 %v720_v26 }
 0x1b5   : > { %v916_v10 = vpop.f32.mrf.mxu0  ;;  %v957_v8 = vpop.f32.mrf.mxu1 }
 0x1b6   : > { %v964_v41 = vadd.f32 %v916_v10, %v646_v61  ;;  %v966_v56 = vadd.f32 %v957_v8, %v648_v57 }
 0x1b7   : > { %v918_v4 = vpop.f32.mrf.mxu0  ;;  %v959_v22 = vpop.f32.mrf.mxu1  ;;  %975 = sbr.rel (%p1875_p2) target bundleno = 913 (0x391), region = 76 }
 0x1b8   : > { %968 = vst [vmem:[#allocation2 + $0x10] sm:$0xff] %v964_v41  ;;  %970 = vst [vmem:[#allocation2 + $0x18] sm:$0xff] %v966_v56  ;;  %v965_v30 = vadd.f32 %v918_v4, %v647_v27  ;;  %v967_v7 = vadd.f32 %v959_v22, %v649_v20 }
 0x1b9   : > { %v920_v40 = vpop.f32.mrf.mxu0  ;;  %v961_v42 = vpop.f32.mrf.mxu1 }
 0x1ba   : > { %969 = vst [vmem:[#allocation2] sm:$0xff] %v965_v30  ;;  %971 = vst [vmem:[#allocation2 + $0x8] sm:$0xff] %v967_v7 }
 0x1bb   : > { %v921_v11 = vpop.f32.mrf.mxu0  ;;  %v962_v23 = vpop.f32.mrf.mxu1 }
 0x1bc   : > { %v2363_v28 = vld [vmem:[#allocation9 + $0x74] ss:$8 sps:$4 sm:$0xff]   ;;  %v2367_v60 = vld [vmem:[#allocation9 + $0x70] ss:$8 sps:$4 sm:$0xff]   ;;  %v2369_v39 = vld [vmem:[#allocation9 + $0x64] ss:$8 sps:$4 sm:$0xff]   ;;  %v982_v59 = vlaneseq }
 0x1bd   : > { %v2365_v32 = vld [vmem:[#allocation9 + $0x174] ss:$8 sps:$4 sm:$0xff]   ;;  %1410 = vmatprep.subr.bf16.mxu0 %v2363_v28  ;;  %v2368_v15 = vld [vmem:[#allocation9 + $0x170] ss:$8 sps:$4 sm:$0xff]   ;;  %v2371_v36 = vld [vmem:[#allocation9 + $0x164] ss:$8 sps:$4 sm:$0xff]  }
 0x1be   : > { %1451 = vmatprep.subr.bf16.mxu1 %v2365_v32  ;;  %1411 = vmatpush1.bf16.msra.mxu0 %v2367_v60  ;;  %v2373_v33 = vld [vmem:[#allocation9 + $0x60] ss:$8 sps:$4 sm:$0xff]   ;;  %v2375_v38 = vld [vmem:[#allocation9 + $0x54] ss:$8 sps:$4 sm:$0xff]   ;;  %v2379_v48 = vld [vmem:[#allocation9 + $0x50] ss:$8 sps:$4 sm:$0xff]  }
 0x1bf   : > { %1452 = vmatpush1.bf16.msra.mxu1 %v2368_v15  ;;  %1412 = vmatprep.subr.bf16.mxu0 %v2369_v39  ;;  %v2374_v46 = vld [vmem:[#allocation9 + $0x160] ss:$8 sps:$4 sm:$0xff]   ;;  %v2377_v54 = vld [vmem:[#allocation9 + $0x154] ss:$8 sps:$4 sm:$0xff]   ;;  %v2380_v2 = vld [vmem:[#allocation9 + $0x150] ss:$8 sps:$4 sm:$0xff]  }
 0x1c0   : > { %1453 = vmatprep.subr.bf16.mxu1 %v2371_v36  ;;  %v2381_v49 = vld [vmem:[#allocation9 + $0x44] ss:$8 sps:$4 sm:$0xff]   ;;  %v2385_v21 = vld [vmem:[#allocation9 + $0x40] ss:$8 sps:$4 sm:$0xff]   ;;  %v2387_v1 = vld [vmem:[#allocation9 + $0x34] ss:$8 sps:$4 sm:$0xff]  }
 0x1c1   : > { %v2383_v16 = vld [vmem:[#allocation9 + $0x144] ss:$8 sps:$4 sm:$0xff]   ;;  %v2386_v18 = vld [vmem:[#allocation9 + $0x140] ss:$8 sps:$4 sm:$0xff]   ;;  %v2389_v52 = vld [vmem:[#allocation9 + $0x134] ss:$8 sps:$4 sm:$0xff]  }
 0x1c2   : > { %1413 = vmatpush1.bf16.msra.mxu0 %v2373_v33  ;;  %v2391_v62 = vld [vmem:[#allocation9 + $0x30] ss:$8 sps:$4 sm:$0xff]   ;;  %v2393_v63 = vld [vmem:[#allocation9 + $0x24] ss:$8 sps:$4 sm:$0xff]   ;;  %v2397_v55 = vld [vmem:[#allocation9 + $0x20] ss:$8 sps:$4 sm:$0xff]  }
 0x1c3   : > { %1454 = vmatpush1.bf16.msra.mxu1 %v2374_v46  ;;  %1414 = vmatprep.subr.bf16.mxu0 %v2375_v38  ;;  %v2392_v58 = vld [vmem:[#allocation9 + $0x130] ss:$8 sps:$4 sm:$0xff]   ;;  %v2395_v43 = vld [vmem:[#allocation9 + $0x124] ss:$8 sps:$4 sm:$0xff]   ;;  %v2398_v34 = vld [vmem:[#allocation9 + $0x120] ss:$8 sps:$4 sm:$0xff]  }
 0x1c4   : > { %1455 = vmatprep.subr.bf16.mxu1 %v2377_v54  ;;  %v2399_v51 = vld [vmem:[#allocation9 + $0x14] ss:$8 sps:$4 sm:$0xff]   ;;  %v2403_v12 = vld [vmem:[#allocation9 + $0x10] ss:$8 sps:$4 sm:$0xff]   ;;  %v2405_v13 = vld [vmem:[#allocation9 + $0x4] ss:$8 sps:$4 sm:$0xff]  }
 0x1c5   : > { %v2401_v50 = vld [vmem:[#allocation9 + $0x114] ss:$8 sps:$4 sm:$0xff]   ;;  %v2404_v0 = vld [vmem:[#allocation9 + $0x110] ss:$8 sps:$4 sm:$0xff]   ;;  %v2407_v5 = vld [vmem:[#allocation9 + $0x104] ss:$8 sps:$4 sm:$0xff]  }
 0x1c6   : > { %1415 = vmatpush1.bf16.msra.mxu0 %v2379_v48  ;;  %v2409_v9 = vld [vmem:[#allocation9] ss:$8 sps:$4 sm:$0xff]   ;;  %v2411_v19 = vld [vmem:[#allocation9 + $0xf4] ss:$8 sps:$4 sm:$0xff]   ;;  %v2415_v47 = vld [vmem:[#allocation9 + $0xf0] ss:$8 sps:$4 sm:$0xff]  }
 0x1c7   : > { %1456 = vmatpush1.bf16.msra.mxu1 %v2380_v2  ;;  %1416 = vmatprep.subr.bf16.mxu0 %v2381_v49  ;;  %v2410_v37 = vld [vmem:[#allocation9 + $0x100] ss:$8 sps:$4 sm:$0xff]   ;;  %v2413_v24 = vld [vmem:[#allocation9 + $0x1f4] ss:$8 sps:$4 sm:$0xff]   ;;  %v2416_v44 = vld [vmem:[#allocation9 + $0x1f0] ss:$8 sps:$4 sm:$0xff]  }
 0x1c8   : > { %1457 = vmatprep.subr.bf16.mxu1 %v2383_v16  ;;  %v2417_v35 = vld [vmem:[#allocation9 + $0xe4] ss:$8 sps:$4 sm:$0xff]   ;;  %v2421_v29 = vld [vmem:[#allocation9 + $0xe0] ss:$8 sps:$4 sm:$0xff]   ;;  %v2423_v14 = vld [vmem:[#allocation9 + $0xd4] ss:$8 sps:$4 sm:$0xff]  }
 0x1c9   : > { %v2419_v6 = vld [vmem:[#allocation9 + $0x1e4] ss:$8 sps:$4 sm:$0xff]   ;;  %v2422_v3 = vld [vmem:[#allocation9 + $0x1e0] ss:$8 sps:$4 sm:$0xff]   ;;  %v3323_v45 = vshrl.u32 %v982_v59, 7  ;;  %v978_v16 = vld [vmem:[#allocation2 + $0x18] sm:$0xff] }
 0x1ca   : > { %1417 = vmatpush1.bf16.msra.mxu0 %v2385_v21  ;;  %v2425_v17 = vld [vmem:[#allocation9 + $0x1d4] ss:$8 sps:$4 sm:$0xff]   ;;  %v2427_v25 = vld [vmem:[#allocation9 + $0xd0] ss:$8 sps:$4 sm:$0xff]   ;;  %v2429_v31 = vld [vmem:[#allocation9 + $0xc4] ss:$8 sps:$4 sm:$0xff]  }
 0x1cb   : > { %1458 = vmatpush1.bf16.msra.mxu1 %v2386_v18  ;;  %1418 = vmatprep.subr.bf16.mxu0 %v2387_v1  ;;  %v2428_v53 = vld [vmem:[#allocation9 + $0x1d0] ss:$8 sps:$4 sm:$0xff]   ;;  %v988_v26 = vsub.s32 1, %v3323_v45  ;;  %v996_v61 = vsub.s32 3, %v3323_v45  ;;  %v2431_v57 = vld [vmem:[#allocation9 + $0x1c4] ss:$8 sps:$4 sm:$0xff]  }
 0x1cc   : > { %1459 = vmatprep.subr.bf16.mxu1 %v2389_v52  ;;  %v2433_v10 = vld [vmem:[#allocation9 + $0xc0] ss:$8 sps:$4 sm:$0xff]   ;;  %v980_v20 = vld [vmem:[#allocation8] sm:$0xf]  ;;  %v984_v56 = vsub.s32 0, %v3323_v45  ;;  %v992_v4 = vsub.s32 2, %v3323_v45 }
 0x1cd   : > { %v2434_v8 = vld [vmem:[#allocation9 + $0x1c0] ss:$8 sps:$4 sm:$0xff]   ;;  %v2435_v22 = vld [vmem:[#allocation9 + $0xb4] ss:$8 sps:$4 sm:$0xff]   ;;  %v989_v30 = vrot.slane %v980_v20, %v988_v26  ;;  %v997_v7 = vrot.slane %v980_v20, %v996_v61  ;;  %v2439_v42 = vld [vmem:[#allocation9 + $0xb0] ss:$8 sps:$4 sm:$0xff]  }
 0x1ce   : > { %1419 = vmatpush1.bf16.msra.mxu0 %v2391_v62  ;;  %v977_v27 = vld [vmem:[#allocation2] sm:$0xff]  ;;  %v979_v41 = vld [vmem:[#allocation2 + $0x8] sm:$0xff]  ;;  %v2440_v28 = vld [vmem:[#allocation9 + $0x1b0] ss:$8 sps:$4 sm:$0xff]   ;;  %v985_v2 = vrot.slane %v980_v20, %v984_v56  ;;  %v993_v49 = vrot.slane %v980_v20, %v992_v4 }
 0x1cf   : > { %1460 = vmatpush1.bf16.msra.mxu1 %v2392_v58  ;;  %1420 = vmatprep.subr.bf16.mxu0 %v2393_v63  ;;  %v2437_v40 = vld [vmem:[#allocation9 + $0x1b4] ss:$8 sps:$4 sm:$0xff]   ;;  %v1003_v11 = vadd.f32 %v989_v30, %v977_v27  ;;  %v1005_v23 = vadd.f32 %v997_v7, %v979_v41  ;;  %v2441_v32 = vld [vmem:[#allocation9 + $0xa4] ss:$8 sps:$4 sm:$0xff]   ;;  %v2445_v36 = vld [vmem:[#allocation9 + $0xa0] ss:$8 sps:$4 sm:$0xff]  }
 0x1d0   : > { %1461 = vmatprep.subr.bf16.mxu1 %v2395_v43  ;;  %v2443_v39 = vld [vmem:[#allocation9 + $0x1a4] ss:$8 sps:$4 sm:$0xff]   ;;  %v2446_v33 = vld [vmem:[#allocation9 + $0x1a0] ss:$8 sps:$4 sm:$0xff]   ;;  %v2447_v54 = vld [vmem:[#allocation9 + $0x94] ss:$8 sps:$4 sm:$0xff]   ;;  %v1004_v63 = vadd.f32 %v993_v49, %v978_v16 }
 0x1d1   : > { %v1007_v60 = vmax.f32 %v1003_v11, 0.0  ;;  %v1009_v15 = vmax.f32 %v1005_v23, 0.0  ;;  %v976_v48 = vld [vmem:[#allocation2 + $0x10] sm:$0xff]  ;;  %v2449_v21 = vld [vmem:[#allocation9 + $0x194] ss:$8 sps:$4 sm:$0xff]  }
 0x1d2   : > { %1421 = vmatpush1.bf16.msra.mxu0 %v2397_v55  ;;  %v2451_v18 = vld [vmem:[#allocation9 + $0x90] ss:$8 sps:$4 sm:$0xff]   ;;  %v2453_v52 = vld [vmem:[#allocation9 + $0x84] ss:$8 sps:$4 sm:$0xff]   ;;  %v1002_v58 = vadd.f32 %v985_v2, %v976_v48  ;;  %v1008_v55 = vmax.f32 %v1004_v63, 0.0 }
 0x1d3   : > { %1462 = vmatpush1.bf16.msra.mxu1 %v2398_v34  ;;  %1422 = vmatprep.subr.bf16.mxu0 %v2399_v51  ;;  %v1011_v46 = vpack.c.bf16 %v1007_v60, %v1007_v60  ;;  %v1013_v38 = vpack.c.bf16 %v1009_v15, %v1009_v15  ;;  %v2452_v1 = vld [vmem:[#allocation9 + $0x190] ss:$8 sps:$4 sm:$0xff]   ;;  %v2455_v62 = vld [vmem:[#allocation9 + $0x184] ss:$8 sps:$4 sm:$0xff]   ;;  %v2457_v34 = vld [vmem:[#allocation9 + $0x80] ss:$8 sps:$4 sm:$0xff]  }
 0x1d4   : > { %1463 = vmatprep.subr.bf16.mxu1 %v2401_v50  ;;  %v1006_v43 = vmax.f32 %v1002_v58, 0.0  ;;  %v2458_v51 = vld [vmem:[#allocation9 + $0x180] ss:$8 sps:$4 sm:$0xff]   ;;  %v2459_v50 = vld [vmem:[#allocation11 + $0x78] sm:$0xff]   ;;  %v2469_v59 = vld [vmem:[#allocation11 + $0x50] sm:$0xff]  }
 0x1d5   : > { %1442 = vmatprep.mubr.bf16.mxu0 %v1011_v46  ;;  %1483 = vmatprep.mubr.bf16.mxu1 %v1013_v38 }
 0x1d6   : > { %1423 = vmatpush1.bf16.msra.mxu0 %v2403_v12  ;;  %v1010_v12 = vpack.c.bf16 %v1006_v43, %v1006_v43 }
 0x1d7   : > { %1464 = vmatpush1.bf16.msra.mxu1 %v2404_v0  ;;  %1424 = vmatprep.subr.bf16.mxu0 %v2405_v13  ;;  %v1012_v0 = vpack.c.bf16 %v1008_v55, %v1008_v55  ;;  %v2460_v13 = vld [vmem:[#allocation11 + $0x38] sm:$0xff]  }
 0x1d8   : > { %1465 = vmatprep.subr.bf16.mxu1 %v2407_v5  ;;  %v2461_v5 = vld [vmem:[#allocation11 + $0x70] sm:$0xff]  }
 0x1da   : > { %1425 = vmatpush1.bf16.msra.mxu0 %v2409_v9  ;;  %v2462_v9 = vld [vmem:[#allocation11 + $0x30] sm:$0xff]  }
 0x1db   : > { %1466 = vmatpush1.bf16.msra.mxu1 %v2410_v37  ;;  %1426 = vmatprep.subr.bf16.mxu0 %v2411_v19  ;;  %v2463_v37 = vld [vmem:[#allocation11 + $0x68] sm:$0xff]  }
 0x1dc   : > { %1467 = vmatprep.subr.bf16.mxu1 %v2413_v24  ;;  %v2464_v19 = vld [vmem:[#allocation11 + $0x28] sm:$0xff]   ;;  %v2465_v24 = vld [vmem:[#allocation11 + $0x60] sm:$0xff]  }
 0x1de   : > { %1427 = vmatpush2.bf16.msra.mxu0 %v2415_v47  ;;  %v2466_v47 = vld [vmem:[#allocation11 + $0x20] sm:$0xff]  }
 0x1df   : > { %1468 = vmatpush2.bf16.msra.mxu1 %v2416_v44  ;;  %1428 = vmatprep.subr.bf16.mxu0 %v2417_v35  ;;  %v2467_v44 = vld [vmem:[#allocation11 + $0x58] sm:$0xff]  }
 0x1e0   : > { %1469 = vmatprep.subr.bf16.mxu1 %v2419_v6  ;;  %v2468_v35 = vld [vmem:[#allocation11 + $0x18] sm:$0xff]   ;;  %v2470_v6 = vld [vmem:[#allocation11 + $0x10] sm:$0xff]  }
 0x1e2   : > { %1429 = vmatpush2.bf16.msra.mxu0 %v2421_v29  ;;  %v2471_v29 = vld [vmem:[#allocation11 + $0x48] sm:$0xff]  }
 0x1e3   : > { %1470 = vmatpush2.bf16.msra.mxu1 %v2422_v3  ;;  %1430 = vmatprep.subr.bf16.mxu0 %v2423_v14  ;;  %v2472_v3 = vld [vmem:[#allocation11 + $0x8] sm:$0xff]   ;;  %v2473_v14 = vld [vmem:[#allocation11 + $0x40] sm:$0xff]  }
 0x1e4   : > { %1471 = vmatprep.subr.bf16.mxu1 %v2425_v17  ;;  %v2474_v17 = vld [vmem:[#allocation11] sm:$0xff]  }
 0x1e6   : > { %1431 = vmatpush2.bf16.msra.mxu0 %v2427_v25  ;;  %v1078_v25 = vld [vmem:[%s3522_s25] sm:$0x3] }
 0x1e7   : > { %1472 = vmatpush2.bf16.msra.mxu1 %v2428_v53  ;;  %1432 = vmatprep.subr.bf16.mxu0 %v2429_v31  ;;  %v1083_v53 = vrot.slane %v1078_v25, %v984_v56  ;;  %v1087_v31 = vrot.slane %v1078_v25, %v988_v26  ;;  %v1940_v26 = vld [vmem:[%s3523_s24] ss:$0 sm:$0xff] }
 0x1e8   : > { %1473 = vmatprep.subr.bf16.mxu1 %v2431_v57 }
 0x1ea   : > { %1433 = vmatpush2.bf16.msra.mxu0 %v2433_v10 }
 0x1eb   : > { %1474 = vmatpush2.bf16.msra.mxu1 %v2434_v8  ;;  %1434 = vmatprep.subr.bf16.mxu0 %v2435_v22 }
 0x1ec   : > { %1475 = vmatprep.subr.bf16.mxu1 %v2437_v40 }
 0x1ee   : > { %1435 = vmatpush2.bf16.msra.mxu0 %v2439_v42 }
 0x1ef   : > { %1476 = vmatpush2.bf16.msra.mxu1 %v2440_v28  ;;  %1436 = vmatprep.subr.bf16.mxu0 %v2441_v32 }
 0x1f0   : > { %1477 = vmatprep.subr.bf16.mxu1 %v2443_v39 }
 0x1f2   : > { %1437 = vmatpush2.bf16.msra.mxu0 %v2445_v36 }
 0x1f3   : > { %1478 = vmatpush2.bf16.msra.mxu1 %v2446_v33  ;;  %1438 = vmatprep.subr.bf16.mxu0 %v2447_v54 }
 0x1f4   : > { %1479 = vmatprep.subr.bf16.mxu1 %v2449_v21 }
 0x1f6   : > { %1439 = vmatpush2.bf16.msra.mxu0 %v2451_v18 }
 0x1f7   : > { %1480 = vmatpush2.bf16.msra.mxu1 %v2452_v1  ;;  %1440 = vmatprep.subr.bf16.mxu0 %v2453_v52 }
 0x1f8   : > { %1481 = vmatprep.subr.bf16.mxu1 %v2455_v62 }
 0x1fa   : > { %1441 = vmatpush2.bf16.msra.mxu0 %v2457_v34 }
 0x1fb   : > { %1482 = vmatpush2.bf16.msra.mxu1 %v2458_v51  ;;  %2123 = vmatprep.subr.bf16.mxu0 %v2459_v50 }
 0x1fd   : > { %1443 = vmatmul.mubr.bf16.vlgmr.msra.gmra.mxu0 %v1010_v12 }
 0x1fe   : > { %1484 = vmatmul.mubr.bf16.vlgmr.msra.gmra.mxu1 %v1012_v0  ;;  %2124 = vmatpush3.bf16.msra.mxu0 %v2460_v13 }
 0x1ff   : > { %2125 = vmatprep.subr.bf16.mxu0 %v2461_v5 }
 0x202   : > { %2126 = vmatpush3.bf16.msra.mxu0 %v2462_v9 }
 0x203   : > { %2127 = vmatprep.subr.bf16.mxu0 %v2463_v37 }
 0x206   : > { %2128 = vmatpush3.bf16.msra.mxu0 %v2464_v19 }
 0x207   : > { %2129 = vmatprep.subr.bf16.mxu0 %v2465_v24 }
 0x20a   : > { %2130 = vmatpush3.bf16.msra.mxu0 %v2466_v47 }
 0x20b   : > { %2131 = vmatprep.subr.bf16.mxu0 %v2467_v44 }
 0x20e   : > { %2132 = vmatpush3.bf16.msra.mxu0 %v2468_v35 }
 0x20f   : > { %2133 = vmatprep.subr.bf16.mxu0 %v2469_v59 }
 0x212   : > { %2134 = vmatpush3.bf16.msra.mxu0 %v2470_v6 }
 0x213   : > { %2135 = vmatprep.subr.bf16.mxu0 %v2471_v29 }
 0x216   : > { %2136 = vmatpush3.bf16.msra.mxu0 %v2472_v3 }
 0x217   : > { %2137 = vmatprep.subr.bf16.mxu0 %v2473_v14 }
 0x21a   : > { %2138 = vmatpush3.bf16.msra.mxu0 %v2474_v17 }
 0x2bd   : > { %v1444_v61 = vpop.f32.mrf.mxu0 }
 0x2be   : > { %v1485_v57 = vpop.f32.mrf.mxu1  ;;  %v1445_v10 = vadd.f32 %v1444_v61, %v1083_v53 }
 0x2bf   : > { %v1446_v8 = vpop.f32.mrf.mxu0 }
 0x2c0   : > { %v1487_v27 = vpop.f32.mrf.mxu1  ;;  %v1486_v20 = vadd.f32 %v1485_v57, %v1445_v10  ;;  %v1447_v41 = vadd.f32 %v1446_v8, %v1087_v31 }
 0x2c1   : > { %v1448_v4 = vpop.f32.mrf.mxu0 }
 0x2c2   : > { %v1489_v22 = vpop.f32.mrf.mxu1  ;;  %v1488_v30 = vadd.f32 %v1487_v27, %v1447_v41  ;;  %v1492_v7 = vmax.f32 %v1486_v20, 0.0 }
 0x2c3   : > { %v1449_v40 = vpop.f32.mrf.mxu0 }
 0x2c4   : > { %v1490_v42 = vpop.f32.mrf.mxu1  ;;  %v1493_v11 = vmax.f32 %v1488_v30, 0.0  ;;  %v1494_v56 = vpack.c.bf16 %v1492_v7, %v1492_v7 }
 0x2c6   : > { %v1495_v23 = vpack.c.bf16 %v1493_v11, %v1493_v11 }
 0x2c8   : > { %1663 = vmatprep.mubr.bf16.mxu0 %v1495_v23 }
 0x2c9   : > { %1664 = vmatmul.mubr.bf16.vlgmr.msra.gmra.mxu0 %v1494_v56 }
 0x389   : > { %v2139_v45 = vpop.f32.mrf.mxu0 }
 0x38b   : > { %v2140_v28 = vpop.f32.mrf.mxu0 }
 0x38c   : > { %v2141_v32 = vadd.f32 %v2140_v28, %v2139_v45 }
 0x38d   : > { %v2142_v60 = vpop.f32.mrf.mxu0 }
 0x38e   : > { %v1666_v15 = vadd.f32 %v2141_v32, %v1940_v26 }
 0x38f   : > { %v2143_v39 = vpop.f32.mrf.mxu0 }
 0x390   : > { %1671 = vst [vmem:[%s394_s15] sm:$0xff] %v1666_v15 }
 0x391 PF: > { %s3524_s23 = sld [smem:[#allocation21_spill]]  ;;  %s1686_s18 = sshll.u32 %s394_s15, 4  ;;  %s1687_s18 = int_to_ptr.vmem [resolvable:$true] %s1686_s18 }
 0x392   : > { %s3526_s21 = sld [smem:[#allocation25_spill]]  ;;  %s1673_s17 = scalar_lea.sflag [#allocation5], %s392_s6 }
 0x393   : > { %s3527_s22 = sld [smem:[#allocation35_spill]]  ;;  %s2609_s20 = scalar_lea.vmem %s1687_s18, 128 }
 0x394   : > { %p2610_p5 = scmp.ne.s32.totalorder %s1687_s18, %s2609_s20  ;;  %s2780_s7 = smov [#allocation12]  }
 0x395   : > { %s2613_s0 = sshll.u32 %s2780_s7, 4  ;;  %s2614_s0 = int_to_ptr.vmem [resolvable:$false] %s2613_s0 }
 0x396   : > { %s2615_s25 = scalar_lea.vmem %s2614_s0, 256  ;;  %p2616_p7 = scmp.lt.s32.totalorder %s1687_s18, %s2614_s0 }
 0x397   : > { %s1958_s13 = sshll.u32 %s3524_s23, 7  ;;  %p2617_p10 = scmp.lt.s32.totalorder %s2615_s25, %s2609_s20 }
 0x398   : > { %p3528_p13 = scmp.ne.s32.totalorder %s3526_s21, 0 }
 0x399   : > { %s1684_s4 = scalar_lea.hbm %s3527_s22, %s1958_s13  ;;  %p2618_p12 = por %p2617_p10, %p2616_p7 }
 0x39a   : > { %p2611_p8 = pnand %p2610_p5, %p3528_p13 }
 0x39c   : > { %p2612_p4 = pneg %p2611_p8 }
 0x39e   : > { %p2619_p6 = pnand %p2618_p12, %p2612_p4 }
 0x3a0   : > { %2622 = shalt.err (!%p2619_p6)
}
 0x3a1   : > { %s2623_s3 = scalar_lea.hbm %s1684_s4, 128  ;;  %s2627_s15 = scalar_lea.hbm %s3527_s22, 256 }
 0x3a2   : > { %p2624_p1 = scmp.ne.s32.totalorder %s1684_s4, %s2623_s3  ;;  %p2628_p0 = scmp.lt.s32.totalorder %s1684_s4, %s3527_s22 }
 0x3a3   : > { %p2629_p11 = scmp.lt.s32.totalorder %s2627_s15, %s2623_s3 }
 0x3a4   : > { %p2625_p9 = pnand %p2624_p1, %p3528_p13 }
 0x3a5   : > { %p2630_p2 = por %p2629_p11, %p2628_p0 }
 0x3a6   : > { %p2626_p3 = pneg %p2625_p9 }
 0x3a8   : > { %p2631_p5 = pnand %p2630_p2, %p2626_p3 }
 0x3aa   : > { %2634 = shalt.err (!%p2631_p5)
}
 0x3ab   : > { %2161 = dma.vmem_to_hbm [thread:$0]  (%p3528_p13), %s1687_s18, 128, %s1684_s4, %s1673_s17  }
 0x3ac PF: > { %s3529_s23 = sld [smem:[#allocation18_spill]]  ;;  %p2191_p8 = scmp.ge.s32.totalorder %s2765_s14, 2 }
 0x3ad   : > { %s3530_s11 = sld [smem:[#allocation26_spill]] }
 0x3b2   : > { %s1698_s13 = sand.u32 1, %s3529_s23  }
 0x3b3   : > { %p3531_p4 = scmp.ne.s32.totalorder %s3530_s11, 0  ;;  %s1699_s30 = scalar_lea.sflag [#allocation5], %s1698_s13 }
 0x3b5   : > { %p2181_p7 = pnand %p2191_p8, %p3531_p4 }
 0x3b7   : > { %p2182_p10 = pneg %p2181_p7 }
 0x3b9   : > { %2708 = dma.done.wait (%p2182_p10), %s1699_s30, 128  }
 0x3ba   : > { %2710 = vsyncadd (%p2182_p10), %s1699_s30, 4294967168  ;;  %s27_s14 = sadd.s32 1, %s2765_s14   ;;  %s3533_s24 = sld [smem:[#allocation19_spill]] }
 0x3bb   : > { %p3370_p12 = scmp.ge.s32.totalorder %s27_s14, 6   ;;  %s3534_s21 = smov %s2999_s27 }
 0x3bc   : > { %s3535_s11 = sld [smem:[#allocation22_spill]]  ;;  %s3538_s25 = smov %s2721_s26 }
 0x3bd   : > { %s3536_s4 = sld [smem:[#allocation27_spill]]  ;;  %s3539_s26 = smov %s2996_s5 }
 0x3be   : > { %s3537_s13 = sld [smem:[#allocation28_spill]]  ;;  %s3540_s27 = smov %s2729_s28 }
 0x3bf   : > { %s3541_s28 = smov %s2733_s29  ;;  %s3542_s29 = smov %s3025_s16 }
 0x3c0   : > { %s3543_s30 = smov %s2741_s8  ;;  %s3544_s8 = smov %s2745_s9 }
 0x3c1   : > { %s3545_s9 = smov %s3534_s21  ;;  %s3546_s10 = smov %s2757_s12 }
 0x3c2   :  { %26 = sbr.rel (!%p3370_p12) target bundleno = 21 (0x15), region = 126 }
 0x3c3   : > { %s3547_s12 = smov %s3536_s4 }
 0x3c7   :  { %1704 = vsyncpa [#allocation4], 1 }
 0x3c8   :  { %1706 = vsyncpa [#allocation4 + $0x1], 1 }
 0x3c9   :  { %1707 = vsyncpa [#allocation7], 1 }
 0x3ca   :  { %1709 = vsyncpa [#allocation7 + $0x1], 1 }
 0x3cb   :  { %1710 = vsyncpa [#allocation10], 1 }
 0x3cc   :  { %1711 = vsyncpa [#allocation5], 1 }
 0x3cd   :  { %1713 = vsyncpa [#allocation5 + $0x1], 1 }

</bundles_post_ra>
